<compile_context>
chip_gen: v6e
topology: v6e:2x2x1
jax: 0.10.0
libtpu: 0.0.40
codegen_flags: <defaults>
</compile_context>

<pallas_src>
import jax
import jax.numpy as jnp
from jax import lax
from jax.experimental import pallas as pl
from jax.experimental.pallas import tpu as pltpu

_BN_EPS = 1e-5
_LEAKY_SLOPE = 0.01


def _stats_kernel(xq_ref, xp_ref, wq_ref, bq_ref, wkv_ref, bkv_ref, s_ref):
    """Pass 1 (stats only): per-(batch,channel) BN partial sums.

    xq_ref, xp_ref : (1, C, N)  lane-dense Q / P for one batch element
    wq_ref         : (C, C)     query conv weight
    bq_ref         : (C, 1)
    wkv_ref        : (2C, C)    stacked key/value conv weights
    bkv_ref        : (2C, 1)
    s_ref          : (1, 2, 3C, 1)  row 0 = sum(z), row 1 = sum(z*z);
                     channel order [q(0..C-1), k(C..2C-1), v(2C..3C-1)]
    """
    C = wq_ref.shape[0]
    xq = xq_ref[0]
    xp = xp_ref[0]
    zq = jnp.dot(wq_ref[...], xq, preferred_element_type=jnp.float32) + bq_ref[...]
    zkv = jnp.dot(wkv_ref[...], xp, preferred_element_type=jnp.float32) + bkv_ref[...]
    # NOTE: variance is later formed as E[z^2]-mean^2 (clamped at 0); fine for
    # the test tolerance, a centered pass would be needed for extreme means.
    s_ref[0, 0, 0:C] = jnp.sum(zq, axis=-1, keepdims=True)
    s_ref[0, 0, C:3 * C] = jnp.sum(zkv, axis=-1, keepdims=True)
    s_ref[0, 1, 0:C] = jnp.sum(zq * zq, axis=-1, keepdims=True)
    s_ref[0, 1, C:3 * C] = jnp.sum(zkv * zkv, axis=-1, keepdims=True)


def _attention_kernel(xq_ref, xp_ref, wb_ref, o_ref, act_ref):
    """Pass 2: BN-folded conv recompute + LeakyReLU + frequency attention.

    xq_ref, xp_ref : (1, C, F, T)  raw Q / P for one batch element
    wb_ref         : SMEM (3C, C+1) BN-folded conv [W | b]; rows = q,k,v chans
    o_ref          : (1, C, F, T)
    act_ref        : VMEM scratch (3, C, F, T) — activated q / k / v
    """
    _, C, F, T = xq_ref.shape
    xq = xq_ref[0]                                   # (C, F, T)
    xp = xp_ref[0]

    # --- folded 1x1 convs + LeakyReLU, computed once and kept in VMEM -------
    # (C is small here; for large C an MXU matmul over a (C, F*T) view would
    #  replace this scalar-FMA accumulation.)
    for br, x in ((0, xq), (1, xp), (2, xp)):
        for o in range(C):
            row = br * C + o
            z = wb_ref[row, C] + wb_ref[row, 0] * x[0]
            for c in range(1, C):
                z = z + wb_ref[row, c] * x[c]
            act_ref[br, o] = jnp.where(z >= 0, z, _LEAKY_SLOPE * z)

    q3 = act_ref[0]                                  # (C, F, T)
    k3 = act_ref[1]
    v3 = act_ref[2]

    # S[f1, f2] = sum_{c,t} q[c,f1,t] * k[c,f2,t]   (== query_F @ key_F^T)
    s_c = lax.dot_general(q3, k3, (((2,), (2,)), ((0,), (0,))),
                          preferred_element_type=jnp.float32)    # (C, F, F)
    s = jnp.sum(s_c, axis=0)                                     # (F_q, F_k)

    # torch.nn.Softmax(dim=1) on [B, F_q, F_k] -> softmax over the F_q axis.
    s = s - jnp.max(s, axis=0, keepdims=True)
    e = jnp.exp(s)
    wgt = e * pl.reciprocal(jnp.sum(e, axis=0, keepdims=True), approx=True)

    # out[c] = softmax(S) @ v[c]  — single batched contraction, stays [C,F,T].
    wgt_b = jnp.broadcast_to(wgt[None], (C, F, F))
    out3 = lax.dot_general(wgt_b, v3, (((2,), (1,)), ((0,), (0,))),
                           preferred_element_type=jnp.float32)   # (C, F, T)
    o_ref[0] = out3.astype(o_ref.dtype)


@jax.jit
def self_attention_freq(P, Q,
                        Wq, bq, gq, betaq,
                        Wk, bk, gk, betak,
                        Wv, bv, gv, betav):
    """P, Q: [B, C, F, T].  Conv weights W*: [C, C]; biases/BN params: [C]."""
    B, C, F, T = P.shape
    N = F * T
    n_tot = B * N
    f32 = jnp.float32

    Pf = P.astype(f32)
    Qf = Q.astype(f32)
    Q2 = Qf.reshape(B, C, N)          # free views (no HBM copies)
    P2 = Pf.reshape(B, C, N)

    wq = Wq.astype(f32)
    wkv = jnp.concatenate([Wk, Wv], axis=0).astype(f32)           # (2C, C)
    bq_ = bq.astype(f32).reshape(C, 1)
    bkv = jnp.concatenate([bk, bv]).astype(f32).reshape(2 * C, 1)

    # ---- Pass 1: BN partial stats only (no activation writeback) -----------
    stats = pl.pallas_call(
        _stats_kernel,
        out_shape=jax.ShapeDtypeStruct((B, 2, 3 * C, 1), f32),
        grid=(B,),
        in_specs=[
            pl.BlockSpec((1, C, N), lambda b: (b, 0, 0)),
            pl.BlockSpec((1, C, N), lambda b: (b, 0, 0)),
            pl.BlockSpec((C, C), lambda b: (0, 0)),
            pl.BlockSpec((C, 1), lambda b: (0, 0)),
            pl.BlockSpec((2 * C, C), lambda b: (0, 0)),
            pl.BlockSpec((2 * C, 1), lambda b: (0, 0)),
        ],
        out_specs=pl.BlockSpec((1, 2, 3 * C, 1), lambda b: (b, 0, 0, 0)),
        compiler_params=pltpu.CompilerParams(
            dimension_semantics=("parallel",)),
    )(Q2, P2, wq, bq_, wkv, bkv)

    # ---- Finalize BN (training mode, biased var) and fold into the conv ----
    tot = jnp.sum(stats, axis=0)[..., 0]            # (2, 3C)
    mean = tot[0] / n_tot
    var = jnp.maximum(tot[1] / n_tot - mean * mean, 0.0)
    gamma = jnp.concatenate([gq, gk, gv]).astype(f32)
    beta = jnp.concatenate([betaq, betak, betav]).astype(f32)
    scale = gamma * lax.rsqrt(var + _BN_EPS)        # (3C,)
    shift = beta - mean * scale
    w_all = jnp.concatenate([Wq, Wk, Wv], axis=0).astype(f32)     # (3C, C)
    b_all = jnp.concatenate([bq, bk, bv]).astype(f32)             # (3C,)
    w_fold = scale[:, None] * w_all
    b_fold = scale * b_all + shift
    wb = jnp.concatenate([w_fold, b_fold[:, None]], axis=1)       # (3C, C+1)

    # ---- Pass 2: folded conv recompute + LeakyReLU + frequency attention ---
    out = pl.pallas_call(
        _attention_kernel,
        out_shape=jax.ShapeDtypeStruct((B, C, F, T), P.dtype),
        grid=(B,),
        in_specs=[
            pl.BlockSpec((1, C, F, T), lambda b: (b, 0, 0, 0)),
            pl.BlockSpec((1, C, F, T), lambda b: (b, 0, 0, 0)),
            pl.BlockSpec(memory_space=pltpu.MemorySpace.SMEM),
        ],
        out_specs=pl.BlockSpec((1, C, F, T), lambda b: (b, 0, 0, 0)),
        scratch_shapes=[pltpu.VMEM((3, C, F, T), f32)],
        compiler_params=pltpu.CompilerParams(
            dimension_semantics=("parallel",)),
    )(Qf, Pf, wb)

    return out


def _reference(P, Q, Wq, bq, gq, betaq, Wk, bk, gk, betak, Wv, bv, gv, betav):
    """Pure-JAX replica of the PyTorch forward (isComplex=False, training BN)."""
    hi = lax.Precision.HIGHEST

    def branch(x, W, b, g, bt):
        z = jnp.einsum("oc,bcft->boft", W, x, precision=hi) \
            + b[None, :, None, None]
        mean = jnp.mean(z, axis=(0, 2, 3), keepdims=True)
        var = jnp.mean((z - mean) ** 2, axis=(0, 2, 3), keepdims=True)
        y = g[None, :, None, None] * (z - mean) / jnp.sqrt(var + _BN_EPS) \
            + bt[None, :, None, None]
        return jnp.where(y >= 0, y, _LEAKY_SLOPE * y)

    q = branch(Q, Wq, bq, gq, betaq)
    k = branch(P, Wk, bk, gk, betak)
    v = branch(P, Wv, bv, gv, betav)
    B, C, F, T = P.shape
    qF = q.transpose(0, 2, 1, 3).reshape(B, F, C * T)
    kF = k.transpose(0, 2, 1, 3).reshape(B, F, C * T)
    vF = v.transpose(0, 2, 1, 3).reshape(B, F, C * T)
    S = jnp.einsum("bfn,bgn->bfg", qF, kF, precision=hi)
    S = S - jnp.max(S, axis=1, keepdims=True)       # Softmax(dim=1)
    wgt = jnp.exp(S)
    wgt = wgt / jnp.sum(wgt, axis=1, keepdims=True)
    out = jnp.einsum("bfg,bgn->bfn", wgt, vF, precision=hi)
    return out.reshape(B, F, C, T).transpose(0, 2, 1, 3)


if __name__ == "__main__":
    key = jax.random.PRNGKey(0)
    B, C, F, T = 2, 4, 16, 128

    ks = jax.random.split(key, 16)
    P = jax.random.normal(ks[0], (B, C, F, T), dtype=jnp.float32)
    Q = jax.random.normal(ks[1], (B, C, F, T), dtype=jnp.float32)

    Wq = 0.3 * jax.random.normal(ks[2], (C, C), dtype=jnp.float32)
    Wk = 0.3 * jax.random.normal(ks[3], (C, C), dtype=jnp.float32)
    Wv = 0.3 * jax.random.normal(ks[4], (C, C), dtype=jnp.float32)
    bq = 0.1 * jax.random.normal(ks[5], (C,), dtype=jnp.float32)
    bk = 0.1 * jax.random.normal(ks[6], (C,), dtype=jnp.float32)
    bv = 0.1 * jax.random.normal(ks[7], (C,), dtype=jnp.float32)
    gq = 0.5 + 0.1 * jax.random.normal(ks[8], (C,), dtype=jnp.float32)
    gk = 0.5 + 0.1 * jax.random.normal(ks[9], (C,), dtype=jnp.float32)
    gv = 0.5 + 0.1 * jax.random.normal(ks[10], (C,), dtype=jnp.float32)
    betaq = 0.1 * jax.random.normal(ks[11], (C,), dtype=jnp.float32)
    betak = 0.1 * jax.random.normal(ks[12], (C,), dtype=jnp.float32)
    betav = 0.1 * jax.random.normal(ks[13], (C,), dtype=jnp.float32)

    out = self_attention_freq(P, Q, Wq, bq, gq, betaq,
                              Wk, bk, gk, betak, Wv, bv, gv, betav)
    out = jax.block_until_ready(out)

    ref = _reference(P, Q, Wq, bq, gq, betaq,
                     Wk, bk, gk, betak, Wv, bv, gv, betav)

    assert out.shape == (B, C, F, T)
    assert jnp.allclose(out, ref, atol=1e-2, rtol=1e-2)

    # TODO(synk): isComplex=True branch (ComplexConv2d / softmax of complex
    # magnitude) and BatchNorm running-stat momentum updates are not emitted.
    print("KERNEL_OK")
</pallas_src>

<mosaic_0001>
module attributes {stable_mosaic.version = 11 : i64} {
  func.func @_stats_kernel(%arg0: i32, %arg1: memref<1x4x2048xf32, #tpu.memory_space<vmem>>, %arg2: memref<1x4x2048xf32, #tpu.memory_space<vmem>>, %arg3: memref<4x4xf32, #tpu.memory_space<vmem>>, %arg4: memref<4x1xf32, #tpu.memory_space<vmem>>, %arg5: memref<8x4xf32, #tpu.memory_space<vmem>>, %arg6: memref<8x1xf32, #tpu.memory_space<vmem>>, %arg7: memref<1x2x12x1xf32, #tpu.memory_space<vmem>>) attributes {dimension_semantics = [#tpu.dimension_semantics<parallel>], iteration_bounds = array<i64: 2>, scalar_prefetch = 0 : i64, scratch_operands = 0 : i64, tpu.core_type = #tpu.core_type<tc>, window_params = [{transform_indices = @transform_0, window_bounds = array<i64: 1, 4, 2048>}, {transform_indices = @transform_1, window_bounds = array<i64: 1, 4, 2048>}, {pipeline_mode = #tpu.pipeline_mode<synchronous>, transform_indices = @transform_2, window_bounds = array<i64: 4, 4>}, {pipeline_mode = #tpu.pipeline_mode<synchronous>, transform_indices = @transform_3, window_bounds = array<i64: 4, 1>}, {pipeline_mode = #tpu.pipeline_mode<synchronous>, transform_indices = @transform_4, window_bounds = array<i64: 8, 4>}, {pipeline_mode = #tpu.pipeline_mode<synchronous>, transform_indices = @transform_5, window_bounds = array<i64: 8, 1>}, {transform_indices = @transform_6, window_bounds = array<i64: 1, 2, 12, 1>}]} {
    %c0 = arith.constant 0 : index
    %c0_0 = arith.constant 0 : index
    %c0_1 = arith.constant 0 : index
    %0 = vector.load %arg1[%c0, %c0_0, %c0_1] : memref<1x4x2048xf32, #tpu.memory_space<vmem>>, vector<1x4x2048xf32>
    %1 = vector.shape_cast %0 : vector<1x4x2048xf32> to vector<4x2048xf32>
    %c0_2 = arith.constant 0 : index
    %c0_3 = arith.constant 0 : index
    %c0_4 = arith.constant 0 : index
    %2 = vector.load %arg2[%c0_2, %c0_3, %c0_4] : memref<1x4x2048xf32, #tpu.memory_space<vmem>>, vector<1x4x2048xf32>
    %3 = vector.shape_cast %2 : vector<1x4x2048xf32> to vector<4x2048xf32>
    %c0_5 = arith.constant 0 : index
    %c0_6 = arith.constant 0 : index
    %4 = vector.load %arg3[%c0_5, %c0_6] : memref<4x4xf32, #tpu.memory_space<vmem>>, vector<4x4xf32>
    %cst = arith.constant dense<0.000000e+00> : vector<4x2048xf32>
    %5 = tpu.matmul %4, %1, %cst {dimension_numbers = #tpu.dot_dimension_numbers<[1], [0], [0], [1], [0, 0, 1, 1], [], []>} : vector<4x4xf32>, vector<4x2048xf32>, vector<4x2048xf32> -> vector<4x2048xf32>
    %c0_7 = arith.constant 0 : index
    %c0_8 = arith.constant 0 : index
    %6 = vector.load %arg4[%c0_7, %c0_8] : memref<4x1xf32, #tpu.memory_space<vmem>>, vector<4x1xf32>
    %7 = vector.broadcast %6 : vector<4x1xf32> to vector<4x2048xf32>
    %8 = arith.addf %5, %7 : vector<4x2048xf32>
    %c0_9 = arith.constant 0 : index
    %c0_10 = arith.constant 0 : index
    %9 = vector.load %arg5[%c0_9, %c0_10] : memref<8x4xf32, #tpu.memory_space<vmem>>, vector<8x4xf32>
    %cst_11 = arith.constant dense<0.000000e+00> : vector<8x2048xf32>
    %10 = tpu.matmul %9, %3, %cst_11 {dimension_numbers = #tpu.dot_dimension_numbers<[1], [0], [0], [1], [0, 0, 1, 1], [], []>} : vector<8x4xf32>, vector<4x2048xf32>, vector<8x2048xf32> -> vector<8x2048xf32>
    %c0_12 = arith.constant 0 : index
    %c0_13 = arith.constant 0 : index
    %11 = vector.load %arg6[%c0_12, %c0_13] : memref<8x1xf32, #tpu.memory_space<vmem>>, vector<8x1xf32>
    %12 = vector.broadcast %11 : vector<8x1xf32> to vector<8x2048xf32>
    %13 = arith.addf %10, %12 : vector<8x2048xf32>
    %cst_14 = arith.constant dense<0.000000e+00> : vector<4xf32>
    %14 = vector.multi_reduction <add>, %8, %cst_14 [1] : vector<4x2048xf32> to vector<4xf32>
    %15 = vector.shape_cast %14 : vector<4xf32> to vector<4x1xf32>
    %c0_15 = arith.constant 0 : index
    %c0_16 = arith.constant 0 : index
    %c0_17 = arith.constant 0 : index
    %c0_18 = arith.constant 0 : index
    %16 = vector.load %arg7[%c0_15, %c0_16, %c0_17, %c0_18] : memref<1x2x12x1xf32, #tpu.memory_space<vmem>>, vector<1x1x4x1xf32>
    %17 = vector.shape_cast %16 : vector<1x1x4x1xf32> to vector<4x1xf32>
    %18 = vector.shape_cast %15 : vector<4x1xf32> to vector<1x1x4x1xf32>
    tpu.vector_store %arg7[%c0_15, %c0_16, %c0_17, %c0_18], %18 {strides = array<i32>} : memref<1x2x12x1xf32, #tpu.memory_space<vmem>>, vector<1x1x4x1xf32>,
    %cst_19 = arith.constant dense<0.000000e+00> : vector<8xf32>
    %19 = vector.multi_reduction <add>, %13, %cst_19 [1] : vector<8x2048xf32> to vector<8xf32>
    %20 = vector.shape_cast %19 : vector<8xf32> to vector<8x1xf32>
    %c0_20 = arith.constant 0 : index
    %c0_21 = arith.constant 0 : index
    %c4 = arith.constant 4 : index
    %c0_22 = arith.constant 0 : index
    %21 = vector.load %arg7[%c0_20, %c0_21, %c4, %c0_22] : memref<1x2x12x1xf32, #tpu.memory_space<vmem>>, vector<1x1x8x1xf32>
    %22 = vector.shape_cast %21 : vector<1x1x8x1xf32> to vector<8x1xf32>
    %23 = vector.shape_cast %20 : vector<8x1xf32> to vector<1x1x8x1xf32>
    tpu.vector_store %arg7[%c0_20, %c0_21, %c4, %c0_22], %23 {strides = array<i32>} : memref<1x2x12x1xf32, #tpu.memory_space<vmem>>, vector<1x1x8x1xf32>,
    %24 = arith.mulf %8, %8 : vector<4x2048xf32>
    %cst_23 = arith.constant dense<0.000000e+00> : vector<4xf32>
    %25 = vector.multi_reduction <add>, %24, %cst_23 [1] : vector<4x2048xf32> to vector<4xf32>
    %26 = vector.shape_cast %25 : vector<4xf32> to vector<4x1xf32>
    %c0_24 = arith.constant 0 : index
    %c1 = arith.constant 1 : index
    %c0_25 = arith.constant 0 : index
    %c0_26 = arith.constant 0 : index
    %27 = vector.load %arg7[%c0_24, %c1, %c0_25, %c0_26] : memref<1x2x12x1xf32, #tpu.memory_space<vmem>>, vector<1x1x4x1xf32>
    %28 = vector.shape_cast %27 : vector<1x1x4x1xf32> to vector<4x1xf32>
    %29 = vector.shape_cast %26 : vector<4x1xf32> to vector<1x1x4x1xf32>
    tpu.vector_store %arg7[%c0_24, %c1, %c0_25, %c0_26], %29 {strides = array<i32>} : memref<1x2x12x1xf32, #tpu.memory_space<vmem>>, vector<1x1x4x1xf32>,
    %30 = arith.mulf %13, %13 : vector<8x2048xf32>
    %cst_27 = arith.constant dense<0.000000e+00> : vector<8xf32>
    %31 = vector.multi_reduction <add>, %30, %cst_27 [1] : vector<8x2048xf32> to vector<8xf32>
    %32 = vector.shape_cast %31 : vector<8xf32> to vector<8x1xf32>
    %c0_28 = arith.constant 0 : index
    %c1_29 = arith.constant 1 : index
    %c4_30 = arith.constant 4 : index
    %c0_31 = arith.constant 0 : index
    %33 = vector.load %arg7[%c0_28, %c1_29, %c4_30, %c0_31] : memref<1x2x12x1xf32, #tpu.memory_space<vmem>>, vector<1x1x8x1xf32>
    %34 = vector.shape_cast %33 : vector<1x1x8x1xf32> to vector<8x1xf32>
    %35 = vector.shape_cast %32 : vector<8x1xf32> to vector<1x1x8x1xf32>
    tpu.vector_store %arg7[%c0_28, %c1_29, %c4_30, %c0_31], %35 {strides = array<i32>} : memref<1x2x12x1xf32, #tpu.memory_space<vmem>>, vector<1x1x8x1xf32>,
    return
  }
  func.func @transform_0(%arg0: i32) -> (i32, i32, i32) {
    %c0_i32 = arith.constant 0 : i32
    %c0_i32_0 = arith.constant 0 : i32
    %c0_i32_1 = arith.constant 0 : i32
    return %arg0, %c0_i32, %c0_i32_0 : i32, i32, i32
  }
  func.func @transform_1(%arg0: i32) -> (i32, i32, i32) {
    %c0_i32 = arith.constant 0 : i32
    %c0_i32_0 = arith.constant 0 : i32
    %c0_i32_1 = arith.constant 0 : i32
    return %arg0, %c0_i32, %c0_i32_0 : i32, i32, i32
  }
  func.func @transform_2(%arg0: i32) -> (i32, i32) {
    %c0_i32 = arith.constant 0 : i32
    %c0_i32_0 = arith.constant 0 : i32
    %c0_i32_1 = arith.constant 0 : i32
    return %c0_i32, %c0_i32_0 : i32, i32
  }
  func.func @transform_3(%arg0: i32) -> (i32, i32) {
    %c0_i32 = arith.constant 0 : i32
    %c0_i32_0 = arith.constant 0 : i32
    %c0_i32_1 = arith.constant 0 : i32
    return %c0_i32, %c0_i32_0 : i32, i32
  }
  func.func @transform_4(%arg0: i32) -> (i32, i32) {
    %c0_i32 = arith.constant 0 : i32
    %c0_i32_0 = arith.constant 0 : i32
    %c0_i32_1 = arith.constant 0 : i32
    return %c0_i32, %c0_i32_0 : i32, i32
  }
  func.func @transform_5(%arg0: i32) -> (i32, i32) {
    %c0_i32 = arith.constant 0 : i32
    %c0_i32_0 = arith.constant 0 : i32
    %c0_i32_1 = arith.constant 0 : i32
    return %c0_i32, %c0_i32_0 : i32, i32
  }
  func.func @transform_6(%arg0: i32) -> (i32, i32, i32, i32) {
    %c0_i32 = arith.constant 0 : i32
    %c0_i32_0 = arith.constant 0 : i32
    %c0_i32_1 = arith.constant 0 : i32
    %c0_i32_2 = arith.constant 0 : i32
    return %arg0, %c0_i32, %c0_i32_0, %c0_i32_1 : i32, i32, i32, i32
  }
}

module attributes {stable_mosaic.version = 11 : i64} {
  func.func @_attention_kernel(%arg0: i32, %arg1: memref<1x4x16x128xf32, #tpu.memory_space<vmem>>, %arg2: memref<1x4x16x128xf32, #tpu.memory_space<vmem>>, %arg3: memref<12x5xf32, #tpu.memory_space<smem>>, %arg4: memref<1x4x16x128xf32, #tpu.memory_space<vmem>>, %arg5: memref<3x4x16x128xf32, #tpu.memory_space<vmem>>) attributes {dimension_semantics = [#tpu.dimension_semantics<parallel>], iteration_bounds = array<i64: 2>, scalar_prefetch = 0 : i64, scratch_operands = 1 : i64, tpu.core_type = #tpu.core_type<tc>, window_params = [{transform_indices = @transform_0, window_bounds = array<i64: 1, 4, 16, 128>}, {transform_indices = @transform_1, window_bounds = array<i64: 1, 4, 16, 128>}, {transform_indices = @transform_2, window_bounds = array<i64: 12, 5>}, {transform_indices = @transform_3, window_bounds = array<i64: 1, 4, 16, 128>}]} {
    %c0 = arith.constant 0 : index
    %c0_0 = arith.constant 0 : index
    %c0_1 = arith.constant 0 : index
    %c0_2 = arith.constant 0 : index
    %0 = vector.load %arg1[%c0, %c0_0, %c0_1, %c0_2] : memref<1x4x16x128xf32, #tpu.memory_space<vmem>>, vector<1x4x16x128xf32>
    %1 = vector.shape_cast %0 : vector<1x4x16x128xf32> to vector<4x16x128xf32>
    %c0_3 = arith.constant 0 : index
    %c0_4 = arith.constant 0 : index
    %c0_5 = arith.constant 0 : index
    %c0_6 = arith.constant 0 : index
    %2 = vector.load %arg2[%c0_3, %c0_4, %c0_5, %c0_6] : memref<1x4x16x128xf32, #tpu.memory_space<vmem>>, vector<1x4x16x128xf32>
    %3 = vector.shape_cast %2 : vector<1x4x16x128xf32> to vector<4x16x128xf32>
    %c0_7 = arith.constant 0 : index
    %c4 = arith.constant 4 : index
    %4 = memref.load %arg3[%c0_7, %c4] : memref<12x5xf32, #tpu.memory_space<smem>>
    %c0_8 = arith.constant 0 : index
    %c0_9 = arith.constant 0 : index
    %5 = memref.load %arg3[%c0_8, %c0_9] : memref<12x5xf32, #tpu.memory_space<smem>>
    %6 = vector.extract_strided_slice %1 {offsets = [0, 0, 0], sizes = [1, 16, 128], strides = [1, 1, 1]} : vector<4x16x128xf32> to vector<1x16x128xf32>
    %7 = vector.shape_cast %6 : vector<1x16x128xf32> to vector<16x128xf32>
    %8 = vector.broadcast %5 : f32 to vector<16x128xf32>
    %9 = arith.mulf %8, %7 : vector<16x128xf32>
    %10 = vector.broadcast %4 : f32 to vector<16x128xf32>
    %11 = arith.addf %10, %9 : vector<16x128xf32>
    %c0_10 = arith.constant 0 : index
    %c1 = arith.constant 1 : index
    %12 = memref.load %arg3[%c0_10, %c1] : memref<12x5xf32, #tpu.memory_space<smem>>
    %13 = vector.extract_strided_slice %1 {offsets = [1, 0, 0], sizes = [1, 16, 128], strides = [1, 1, 1]} : vector<4x16x128xf32> to vector<1x16x128xf32>
    %14 = vector.shape_cast %13 : vector<1x16x128xf32> to vector<16x128xf32>
    %15 = vector.broadcast %12 : f32 to vector<16x128xf32>
    %16 = arith.mulf %15, %14 : vector<16x128xf32>
    %17 = arith.addf %11, %16 : vector<16x128xf32>
    %c0_11 = arith.constant 0 : index
    %c2 = arith.constant 2 : index
    %18 = memref.load %arg3[%c0_11, %c2] : memref<12x5xf32, #tpu.memory_space<smem>>
    %19 = vector.extract_strided_slice %1 {offsets = [2, 0, 0], sizes = [1, 16, 128], strides = [1, 1, 1]} : vector<4x16x128xf32> to vector<1x16x128xf32>
    %20 = vector.shape_cast %19 : vector<1x16x128xf32> to vector<16x128xf32>
    %21 = vector.broadcast %18 : f32 to vector<16x128xf32>
    %22 = arith.mulf %21, %20 : vector<16x128xf32>
    %23 = arith.addf %17, %22 : vector<16x128xf32>
    %c0_12 = arith.constant 0 : index
    %c3 = arith.constant 3 : index
    %24 = memref.load %arg3[%c0_12, %c3] : memref<12x5xf32, #tpu.memory_space<smem>>
    %25 = vector.extract_strided_slice %1 {offsets = [3, 0, 0], sizes = [1, 16, 128], strides = [1, 1, 1]} : vector<4x16x128xf32> to vector<1x16x128xf32>
    %26 = vector.shape_cast %25 : vector<1x16x128xf32> to vector<16x128xf32>
    %27 = vector.broadcast %24 : f32 to vector<16x128xf32>
    %28 = arith.mulf %27, %26 : vector<16x128xf32>
    %29 = arith.addf %23, %28 : vector<16x128xf32>
    %cst = arith.constant 0.000000e+00 : f32
    %30 = vector.broadcast %cst : f32 to vector<16x128xf32>
    %31 = arith.cmpf oge, %29, %30 : vector<16x128xf32>
    %cst_13 = arith.constant 0.00999999977 : f32
    %32 = vector.broadcast %cst_13 : f32 to vector<16x128xf32>
    %33 = arith.mulf %32, %29 : vector<16x128xf32>
    %34 = arith.select %31, %29, %33 : vector<16x128xi1>, vector<16x128xf32>
    %c0_14 = arith.constant 0 : index
    %c0_15 = arith.constant 0 : index
    %c0_16 = arith.constant 0 : index
    %c0_17 = arith.constant 0 : index
    %35 = vector.load %arg5[%c0_14, %c0_15, %c0_16, %c0_17] : memref<3x4x16x128xf32, #tpu.memory_space<vmem>>, vector<1x1x16x128xf32>
    %36 = vector.shape_cast %35 : vector<1x1x16x128xf32> to vector<16x128xf32>
    %37 = vector.shape_cast %34 : vector<16x128xf32> to vector<1x1x16x128xf32>
    tpu.vector_store %arg5[%c0_14, %c0_15, %c0_16, %c0_17], %37 {strides = array<i32>} : memref<3x4x16x128xf32, #tpu.memory_space<vmem>>, vector<1x1x16x128xf32>,
    %c1_18 = arith.constant 1 : index
    %c4_19 = arith.constant 4 : index
    %38 = memref.load %arg3[%c1_18, %c4_19] : memref<12x5xf32, #tpu.memory_space<smem>>
    %c1_20 = arith.constant 1 : index
    %c0_21 = arith.constant 0 : index
    %39 = memref.load %arg3[%c1_20, %c0_21] : memref<12x5xf32, #tpu.memory_space<smem>>
    %40 = vector.extract_strided_slice %1 {offsets = [0, 0, 0], sizes = [1, 16, 128], strides = [1, 1, 1]} : vector<4x16x128xf32> to vector<1x16x128xf32>
    %41 = vector.shape_cast %40 : vector<1x16x128xf32> to vector<16x128xf32>
    %42 = vector.broadcast %39 : f32 to vector<16x128xf32>
    %43 = arith.mulf %42, %41 : vector<16x128xf32>
    %44 = vector.broadcast %38 : f32 to vector<16x128xf32>
    %45 = arith.addf %44, %43 : vector<16x128xf32>
    %c1_22 = arith.constant 1 : index
    %c1_23 = arith.constant 1 : index
    %46 = memref.load %arg3[%c1_22, %c1_23] : memref<12x5xf32, #tpu.memory_space<smem>>
    %47 = vector.extract_strided_slice %1 {offsets = [1, 0, 0], sizes = [1, 16, 128], strides = [1, 1, 1]} : vector<4x16x128xf32> to vector<1x16x128xf32>
    %48 = vector.shape_cast %47 : vector<1x16x128xf32> to vector<16x128xf32>
    %49 = vector.broadcast %46 : f32 to vector<16x128xf32>
    %50 = arith.mulf %49, %48 : vector<16x128xf32>
    %51 = arith.addf %45, %50 : vector<16x128xf32>
    %c1_24 = arith.constant 1 : index
    %c2_25 = arith.constant 2 : index
    %52 = memref.load %arg3[%c1_24, %c2_25] : memref<12x5xf32, #tpu.memory_space<smem>>
    %53 = vector.extract_strided_slice %1 {offsets = [2, 0, 0], sizes = [1, 16, 128], strides = [1, 1, 1]} : vector<4x16x128xf32> to vector<1x16x128xf32>
    %54 = vector.shape_cast %53 : vector<1x16x128xf32> to vector<16x128xf32>
    %55 = vector.broadcast %52 : f32 to vector<16x128xf32>
    %56 = arith.mulf %55, %54 : vector<16x128xf32>
    %57 = arith.addf %51, %56 : vector<16x128xf32>
    %c1_26 = arith.constant 1 : index
    %c3_27 = arith.constant 3 : index
    %58 = memref.load %arg3[%c1_26, %c3_27] : memref<12x5xf32, #tpu.memory_space<smem>>
    %59 = vector.extract_strided_slice %1 {offsets = [3, 0, 0], sizes = [1, 16, 128], strides = [1, 1, 1]} : vector<4x16x128xf32> to vector<1x16x128xf32>
    %60 = vector.shape_cast %59 : vector<1x16x128xf32> to vector<16x128xf32>
    %61 = vector.broadcast %58 : f32 to vector<16x128xf32>
    %62 = arith.mulf %61, %60 : vector<16x128xf32>
    %63 = arith.addf %57, %62 : vector<16x128xf32>
    %cst_28 = arith.constant 0.000000e+00 : f32
    %64 = vector.broadcast %cst_28 : f32 to vector<16x128xf32>
    %65 = arith.cmpf oge, %63, %64 : vector<16x128xf32>
    %cst_29 = arith.constant 0.00999999977 : f32
    %66 = vector.broadcast %cst_29 : f32 to vector<16x128xf32>
    %67 = arith.mulf %66, %63 : vector<16x128xf32>
    %68 = arith.select %65, %63, %67 : vector<16x128xi1>, vector<16x128xf32>
    %c0_30 = arith.constant 0 : index
    %c1_31 = arith.constant 1 : index
    %c0_32 = arith.constant 0 : index
    %c0_33 = arith.constant 0 : index
    %69 = vector.load %arg5[%c0_30, %c1_31, %c0_32, %c0_33] : memref<3x4x16x128xf32, #tpu.memory_space<vmem>>, vector<1x1x16x128xf32>
    %70 = vector.shape_cast %69 : vector<1x1x16x128xf32> to vector<16x128xf32>
    %71 = vector.shape_cast %68 : vector<16x128xf32> to vector<1x1x16x128xf32>
    tpu.vector_store %arg5[%c0_30, %c1_31, %c0_32, %c0_33], %71 {strides = array<i32>} : memref<3x4x16x128xf32, #tpu.memory_space<vmem>>, vector<1x1x16x128xf32>,
    %c2_34 = arith.constant 2 : index
    %c4_35 = arith.constant 4 : index
    %72 = memref.load %arg3[%c2_34, %c4_35] : memref<12x5xf32, #tpu.memory_space<smem>>
    %c2_36 = arith.constant 2 : index
    %c0_37 = arith.constant 0 : index
    %73 = memref.load %arg3[%c2_36, %c0_37] : memref<12x5xf32, #tpu.memory_space<smem>>
    %74 = vector.extract_strided_slice %1 {offsets = [0, 0, 0], sizes = [1, 16, 128], strides = [1, 1, 1]} : vector<4x16x128xf32> to vector<1x16x128xf32>
    %75 = vector.shape_cast %74 : vector<1x16x128xf32> to vector<16x128xf32>
    %76 = vector.broadcast %73 : f32 to vector<16x128xf32>
    %77 = arith.mulf %76, %75 : vector<16x128xf32>
    %78 = vector.broadcast %72 : f32 to vector<16x128xf32>
    %79 = arith.addf %78, %77 : vector<16x128xf32>
    %c2_38 = arith.constant 2 : index
    %c1_39 = arith.constant 1 : index
    %80 = memref.load %arg3[%c2_38, %c1_39] : memref<12x5xf32, #tpu.memory_space<smem>>
    %81 = vector.extract_strided_slice %1 {offsets = [1, 0, 0], sizes = [1, 16, 128], strides = [1, 1, 1]} : vector<4x16x128xf32> to vector<1x16x128xf32>
    %82 = vector.shape_cast %81 : vector<1x16x128xf32> to vector<16x128xf32>
    %83 = vector.broadcast %80 : f32 to vector<16x128xf32>
    %84 = arith.mulf %83, %82 : vector<16x128xf32>
    %85 = arith.addf %79, %84 : vector<16x128xf32>
    %c2_40 = arith.constant 2 : index
    %c2_41 = arith.constant 2 : index
    %86 = memref.load %arg3[%c2_40, %c2_41] : memref<12x5xf32, #tpu.memory_space<smem>>
    %87 = vector.extract_strided_slice %1 {offsets = [2, 0, 0], sizes = [1, 16, 128], strides = [1, 1, 1]} : vector<4x16x128xf32> to vector<1x16x128xf32>
    %88 = vector.shape_cast %87 : vector<1x16x128xf32> to vector<16x128xf32>
    %89 = vector.broadcast %86 : f32 to vector<16x128xf32>
    %90 = arith.mulf %89, %88 : vector<16x128xf32>
    %91 = arith.addf %85, %90 : vector<16x128xf32>
    %c2_42 = arith.constant 2 : index
    %c3_43 = arith.constant 3 : index
    %92 = memref.load %arg3[%c2_42, %c3_43] : memref<12x5xf32, #tpu.memory_space<smem>>
    %93 = vector.extract_strided_slice %1 {offsets = [3, 0, 0], sizes = [1, 16, 128], strides = [1, 1, 1]} : vector<4x16x128xf32> to vector<1x16x128xf32>
    %94 = vector.shape_cast %93 : vector<1x16x128xf32> to vector<16x128xf32>
    %95 = vector.broadcast %92 : f32 to vector<16x128xf32>
    %96 = arith.mulf %95, %94 : vector<16x128xf32>
    %97 = arith.addf %91, %96 : vector<16x128xf32>
    %cst_44 = arith.constant 0.000000e+00 : f32
    %98 = vector.broadcast %cst_44 : f32 to vector<16x128xf32>
    %99 = arith.cmpf oge, %97, %98 : vector<16x128xf32>
    %cst_45 = arith.constant 0.00999999977 : f32
    %100 = vector.broadcast %cst_45 : f32 to vector<16x128xf32>
    %101 = arith.mulf %100, %97 : vector<16x128xf32>
    %102 = arith.select %99, %97, %101 : vector<16x128xi1>, vector<16x128xf32>
    %c0_46 = arith.constant 0 : index
    %c2_47 = arith.constant 2 : index
    %c0_48 = arith.constant 0 : index
    %c0_49 = arith.constant 0 : index
    %103 = vector.load %arg5[%c0_46, %c2_47, %c0_48, %c0_49] : memref<3x4x16x128xf32, #tpu.memory_space<vmem>>, vector<1x1x16x128xf32>
    %104 = vector.shape_cast %103 : vector<1x1x16x128xf32> to vector<16x128xf32>
    %105 = vector.shape_cast %102 : vector<16x128xf32> to vector<1x1x16x128xf32>
    tpu.vector_store %arg5[%c0_46, %c2_47, %c0_48, %c0_49], %105 {strides = array<i32>} : memref<3x4x16x128xf32, #tpu.memory_space<vmem>>, vector<1x1x16x128xf32>,
    %c3_50 = arith.constant 3 : index
    %c4_51 = arith.constant 4 : index
    %106 = memref.load %arg3[%c3_50, %c4_51] : memref<12x5xf32, #tpu.memory_space<smem>>
    %c3_52 = arith.constant 3 : index
    %c0_53 = arith.constant 0 : index
    %107 = memref.load %arg3[%c3_52, %c0_53] : memref<12x5xf32, #tpu.memory_space<smem>>
    %108 = vector.extract_strided_slice %1 {offsets = [0, 0, 0], sizes = [1, 16, 128], strides = [1, 1, 1]} : vector<4x16x128xf32> to vector<1x16x128xf32>
    %109 = vector.shape_cast %108 : vector<1x16x128xf32> to vector<16x128xf32>
    %110 = vector.broadcast %107 : f32 to vector<16x128xf32>
    %111 = arith.mulf %110, %109 : vector<16x128xf32>
    %112 = vector.broadcast %106 : f32 to vector<16x128xf32>
    %113 = arith.addf %112, %111 : vector<16x128xf32>
    %c3_54 = arith.constant 3 : index
    %c1_55 = arith.constant 1 : index
    %114 = memref.load %arg3[%c3_54, %c1_55] : memref<12x5xf32, #tpu.memory_space<smem>>
    %115 = vector.extract_strided_slice %1 {offsets = [1, 0, 0], sizes = [1, 16, 128], strides = [1, 1, 1]} : vector<4x16x128xf32> to vector<1x16x128xf32>
    %116 = vector.shape_cast %115 : vector<1x16x128xf32> to vector<16x128xf32>
    %117 = vector.broadcast %114 : f32 to vector<16x128xf32>
    %118 = arith.mulf %117, %116 : vector<16x128xf32>
    %119 = arith.addf %113, %118 : vector<16x128xf32>
    %c3_56 = arith.constant 3 : index
    %c2_57 = arith.constant 2 : index
    %120 = memref.load %arg3[%c3_56, %c2_57] : memref<12x5xf32, #tpu.memory_space<smem>>
    %121 = vector.extract_strided_slice %1 {offsets = [2, 0, 0], sizes = [1, 16, 128], strides = [1, 1, 1]} : vector<4x16x128xf32> to vector<1x16x128xf32>
    %122 = vector.shape_cast %121 : vector<1x16x128xf32> to vector<16x128xf32>
    %123 = vector.broadcast %120 : f32 to vector<16x128xf32>
    %124 = arith.mulf %123, %122 : vector<16x128xf32>
    %125 = arith.addf %119, %124 : vector<16x128xf32>
    %c3_58 = arith.constant 3 : index
    %c3_59 = arith.constant 3 : index
    %126 = memref.load %arg3[%c3_58, %c3_59] : memref<12x5xf32, #tpu.memory_space<smem>>
    %127 = vector.extract_strided_slice %1 {offsets = [3, 0, 0], sizes = [1, 16, 128], strides = [1, 1, 1]} : vector<4x16x128xf32> to vector<1x16x128xf32>
    %128 = vector.shape_cast %127 : vector<1x16x128xf32> to vector<16x128xf32>
    %129 = vector.broadcast %126 : f32 to vector<16x128xf32>
    %130 = arith.mulf %129, %128 : vector<16x128xf32>
    %131 = arith.addf %125, %130 : vector<16x128xf32>
    %cst_60 = arith.constant 0.000000e+00 : f32
    %132 = vector.broadcast %cst_60 : f32 to vector<16x128xf32>
    %133 = arith.cmpf oge, %131, %132 : vector<16x128xf32>
    %cst_61 = arith.constant 0.00999999977 : f32
    %134 = vector.broadcast %cst_61 : f32 to vector<16x128xf32>
    %135 = arith.mulf %134, %131 : vector<16x128xf32>
    %136 = arith.select %133, %131, %135 : vector<16x128xi1>, vector<16x128xf32>
    %c0_62 = arith.constant 0 : index
    %c3_63 = arith.constant 3 : index
    %c0_64 = arith.constant 0 : index
    %c0_65 = arith.constant 0 : index
    %137 = vector.load %arg5[%c0_62, %c3_63, %c0_64, %c0_65] : memref<3x4x16x128xf32, #tpu.memory_space<vmem>>, vector<1x1x16x128xf32>
    %138 = vector.shape_cast %137 : vector<1x1x16x128xf32> to vector<16x128xf32>
    %139 = vector.shape_cast %136 : vector<16x128xf32> to vector<1x1x16x128xf32>
    tpu.vector_store %arg5[%c0_62, %c3_63, %c0_64, %c0_65], %139 {strides = array<i32>} : memref<3x4x16x128xf32, #tpu.memory_space<vmem>>, vector<1x1x16x128xf32>,
    %c4_66 = arith.constant 4 : index
    %c4_67 = arith.constant 4 : index
    %140 = memref.load %arg3[%c4_66, %c4_67] : memref<12x5xf32, #tpu.memory_space<smem>>
    %c4_68 = arith.constant 4 : index
    %c0_69 = arith.constant 0 : index
    %141 = memref.load %arg3[%c4_68, %c0_69] : memref<12x5xf32, #tpu.memory_space<smem>>
    %142 = vector.extract_strided_slice %3 {offsets = [0, 0, 0], sizes = [1, 16, 128], strides = [1, 1, 1]} : vector<4x16x128xf32> to vector<1x16x128xf32>
    %143 = vector.shape_cast %142 : vector<1x16x128xf32> to vector<16x128xf32>
    %144 = vector.broadcast %141 : f32 to vector<16x128xf32>
    %145 = arith.mulf %144, %143 : vector<16x128xf32>
    %146 = vector.broadcast %140 : f32 to vector<16x128xf32>
    %147 = arith.addf %146, %145 : vector<16x128xf32>
    %c4_70 = arith.constant 4 : index
    %c1_71 = arith.constant 1 : index
    %148 = memref.load %arg3[%c4_70, %c1_71] : memref<12x5xf32, #tpu.memory_space<smem>>
    %149 = vector.extract_strided_slice %3 {offsets = [1, 0, 0], sizes = [1, 16, 128], strides = [1, 1, 1]} : vector<4x16x128xf32> to vector<1x16x128xf32>
    %150 = vector.shape_cast %149 : vector<1x16x128xf32> to vector<16x128xf32>
    %151 = vector.broadcast %148 : f32 to vector<16x128xf32>
    %152 = arith.mulf %151, %150 : vector<16x128xf32>
    %153 = arith.addf %147, %152 : vector<16x128xf32>
    %c4_72 = arith.constant 4 : index
    %c2_73 = arith.constant 2 : index
    %154 = memref.load %arg3[%c4_72, %c2_73] : memref<12x5xf32, #tpu.memory_space<smem>>
    %155 = vector.extract_strided_slice %3 {offsets = [2, 0, 0], sizes = [1, 16, 128], strides = [1, 1, 1]} : vector<4x16x128xf32> to vector<1x16x128xf32>
    %156 = vector.shape_cast %155 : vector<1x16x128xf32> to vector<16x128xf32>
    %157 = vector.broadcast %154 : f32 to vector<16x128xf32>
    %158 = arith.mulf %157, %156 : vector<16x128xf32>
    %159 = arith.addf %153, %158 : vector<16x128xf32>
    %c4_74 = arith.constant 4 : index
    %c3_75 = arith.constant 3 : index
    %160 = memref.load %arg3[%c4_74, %c3_75] : memref<12x5xf32, #tpu.memory_space<smem>>
    %161 = vector.extract_strided_slice %3 {offsets = [3, 0, 0], sizes = [1, 16, 128], strides = [1, 1, 1]} : vector<4x16x128xf32> to vector<1x16x128xf32>
    %162 = vector.shape_cast %161 : vector<1x16x128xf32> to vector<16x128xf32>
    %163 = vector.broadcast %160 : f32 to vector<16x128xf32>
    %164 = arith.mulf %163, %162 : vector<16x128xf32>
    %165 = arith.addf %159, %164 : vector<16x128xf32>
    %cst_76 = arith.constant 0.000000e+00 : f32
    %166 = vector.broadcast %cst_76 : f32 to vector<16x128xf32>
    %167 = arith.cmpf oge, %165, %166 : vector<16x128xf32>
    %cst_77 = arith.constant 0.00999999977 : f32
    %168 = vector.broadcast %cst_77 : f32 to vector<16x128xf32>
    %169 = arith.mulf %168, %165 : vector<16x128xf32>
    %170 = arith.select %167, %165, %169 : vector<16x128xi1>, vector<16x128xf32>
    %c1_78 = arith.constant 1 : index
    %c0_79 = arith.constant 0 : index
    %c0_80 = arith.constant 0 : index
    %c0_81 = arith.constant 0 : index
    %171 = vector.load %arg5[%c1_78, %c0_79, %c0_80, %c0_81] : memref<3x4x16x128xf32, #tpu.memory_space<vmem>>, vector<1x1x16x128xf32>
    %172 = vector.shape_cast %171 : vector<1x1x16x128xf32> to vector<16x128xf32>
    %173 = vector.shape_cast %170 : vector<16x128xf32> to vector<1x1x16x128xf32>
    tpu.vector_store %arg5[%c1_78, %c0_79, %c0_80, %c0_81], %173 {strides = array<i32>} : memref<3x4x16x128xf32, #tpu.memory_space<vmem>>, vector<1x1x16x128xf32>,
    %c5 = arith.constant 5 : index
    %c4_82 = arith.constant 4 : index
    %174 = memref.load %arg3[%c5, %c4_82] : memref<12x5xf32, #tpu.memory_space<smem>>
    %c5_83 = arith.constant 5 : index
    %c0_84 = arith.constant 0 : index
    %175 = memref.load %arg3[%c5_83, %c0_84] : memref<12x5xf32, #tpu.memory_space<smem>>
    %176 = vector.extract_strided_slice %3 {offsets = [0, 0, 0], sizes = [1, 16, 128], strides = [1, 1, 1]} : vector<4x16x128xf32> to vector<1x16x128xf32>
    %177 = vector.shape_cast %176 : vector<1x16x128xf32> to vector<16x128xf32>
    %178 = vector.broadcast %175 : f32 to vector<16x128xf32>
    %179 = arith.mulf %178, %177 : vector<16x128xf32>
    %180 = vector.broadcast %174 : f32 to vector<16x128xf32>
    %181 = arith.addf %180, %179 : vector<16x128xf32>
    %c5_85 = arith.constant 5 : index
    %c1_86 = arith.constant 1 : index
    %182 = memref.load %arg3[%c5_85, %c1_86] : memref<12x5xf32, #tpu.memory_space<smem>>
    %183 = vector.extract_strided_slice %3 {offsets = [1, 0, 0], sizes = [1, 16, 128], strides = [1, 1, 1]} : vector<4x16x128xf32> to vector<1x16x128xf32>
    %184 = vector.shape_cast %183 : vector<1x16x128xf32> to vector<16x128xf32>
    %185 = vector.broadcast %182 : f32 to vector<16x128xf32>
    %186 = arith.mulf %185, %184 : vector<16x128xf32>
    %187 = arith.addf %181, %186 : vector<16x128xf32>
    %c5_87 = arith.constant 5 : index
    %c2_88 = arith.constant 2 : index
    %188 = memref.load %arg3[%c5_87, %c2_88] : memref<12x5xf32, #tpu.memory_space<smem>>
    %189 = vector.extract_strided_slice %3 {offsets = [2, 0, 0], sizes = [1, 16, 128], strides = [1, 1, 1]} : vector<4x16x128xf32> to vector<1x16x128xf32>
    %190 = vector.shape_cast %189 : vector<1x16x128xf32> to vector<16x128xf32>
    %191 = vector.broadcast %188 : f32 to vector<16x128xf32>
    %192 = arith.mulf %191, %190 : vector<16x128xf32>
    %193 = arith.addf %187, %192 : vector<16x128xf32>
    %c5_89 = arith.constant 5 : index
    %c3_90 = arith.constant 3 : index
    %194 = memref.load %arg3[%c5_89, %c3_90] : memref<12x5xf32, #tpu.memory_space<smem>>
    %195 = vector.extract_strided_slice %3 {offsets = [3, 0, 0], sizes = [1, 16, 128], strides = [1, 1, 1]} : vector<4x16x128xf32> to vector<1x16x128xf32>
    %196 = vector.shape_cast %195 : vector<1x16x128xf32> to vector<16x128xf32>
    %197 = vector.broadcast %194 : f32 to vector<16x128xf32>
    %198 = arith.mulf %197, %196 : vector<16x128xf32>
    %199 = arith.addf %193, %198 : vector<16x128xf32>
    %cst_91 = arith.constant 0.000000e+00 : f32
    %200 = vector.broadcast %cst_91 : f32 to vector<16x128xf32>
    %201 = arith.cmpf oge, %199, %200 : vector<16x128xf32>
    %cst_92 = arith.constant 0.00999999977 : f32
    %202 = vector.broadcast %cst_92 : f32 to vector<16x128xf32>
    %203 = arith.mulf %202, %199 : vector<16x128xf32>
    %204 = arith.select %201, %199, %203 : vector<16x128xi1>, vector<16x128xf32>
    %c1_93 = arith.constant 1 : index
    %c1_94 = arith.constant 1 : index
    %c0_95 = arith.constant 0 : index
    %c0_96 = arith.constant 0 : index
    %205 = vector.load %arg5[%c1_93, %c1_94, %c0_95, %c0_96] : memref<3x4x16x128xf32, #tpu.memory_space<vmem>>, vector<1x1x16x128xf32>
    %206 = vector.shape_cast %205 : vector<1x1x16x128xf32> to vector<16x128xf32>
    %207 = vector.shape_cast %204 : vector<16x128xf32> to vector<1x1x16x128xf32>
    tpu.vector_store %arg5[%c1_93, %c1_94, %c0_95, %c0_96], %207 {strides = array<i32>} : memref<3x4x16x128xf32, #tpu.memory_space<vmem>>, vector<1x1x16x128xf32>,
    %c6 = arith.constant 6 : index
    %c4_97 = arith.constant 4 : index
    %208 = memref.load %arg3[%c6, %c4_97] : memref<12x5xf32, #tpu.memory_space<smem>>
    %c6_98 = arith.constant 6 : index
    %c0_99 = arith.constant 0 : index
    %209 = memref.load %arg3[%c6_98, %c0_99] : memref<12x5xf32, #tpu.memory_space<smem>>
    %210 = vector.extract_strided_slice %3 {offsets = [0, 0, 0], sizes = [1, 16, 128], strides = [1, 1, 1]} : vector<4x16x128xf32> to vector<1x16x128xf32>
    %211 = vector.shape_cast %210 : vector<1x16x128xf32> to vector<16x128xf32>
    %212 = vector.broadcast %209 : f32 to vector<16x128xf32>
    %213 = arith.mulf %212, %211 : vector<16x128xf32>
    %214 = vector.broadcast %208 : f32 to vector<16x128xf32>
    %215 = arith.addf %214, %213 : vector<16x128xf32>
    %c6_100 = arith.constant 6 : index
    %c1_101 = arith.constant 1 : index
    %216 = memref.load %arg3[%c6_100, %c1_101] : memref<12x5xf32, #tpu.memory_space<smem>>
    %217 = vector.extract_strided_slice %3 {offsets = [1, 0, 0], sizes = [1, 16, 128], strides = [1, 1, 1]} : vector<4x16x128xf32> to vector<1x16x128xf32>
    %218 = vector.shape_cast %217 : vector<1x16x128xf32> to vector<16x128xf32>
    %219 = vector.broadcast %216 : f32 to vector<16x128xf32>
    %220 = arith.mulf %219, %218 : vector<16x128xf32>
    %221 = arith.addf %215, %220 : vector<16x128xf32>
    %c6_102 = arith.constant 6 : index
    %c2_103 = arith.constant 2 : index
    %222 = memref.load %arg3[%c6_102, %c2_103] : memref<12x5xf32, #tpu.memory_space<smem>>
    %223 = vector.extract_strided_slice %3 {offsets = [2, 0, 0], sizes = [1, 16, 128], strides = [1, 1, 1]} : vector<4x16x128xf32> to vector<1x16x128xf32>
    %224 = vector.shape_cast %223 : vector<1x16x128xf32> to vector<16x128xf32>
    %225 = vector.broadcast %222 : f32 to vector<16x128xf32>
    %226 = arith.mulf %225, %224 : vector<16x128xf32>
    %227 = arith.addf %221, %226 : vector<16x128xf32>
    %c6_104 = arith.constant 6 : index
    %c3_105 = arith.constant 3 : index
    %228 = memref.load %arg3[%c6_104, %c3_105] : memref<12x5xf32, #tpu.memory_space<smem>>
    %229 = vector.extract_strided_slice %3 {offsets = [3, 0, 0], sizes = [1, 16, 128], strides = [1, 1, 1]} : vector<4x16x128xf32> to vector<1x16x128xf32>
    %230 = vector.shape_cast %229 : vector<1x16x128xf32> to vector<16x128xf32>
    %231 = vector.broadcast %228 : f32 to vector<16x128xf32>
    %232 = arith.mulf %231, %230 : vector<16x128xf32>
    %233 = arith.addf %227, %232 : vector<16x128xf32>
    %cst_106 = arith.constant 0.000000e+00 : f32
    %234 = vector.broadcast %cst_106 : f32 to vector<16x128xf32>
    %235 = arith.cmpf oge, %233, %234 : vector<16x128xf32>
    %cst_107 = arith.constant 0.00999999977 : f32
    %236 = vector.broadcast %cst_107 : f32 to vector<16x128xf32>
    %237 = arith.mulf %236, %233 : vector<16x128xf32>
    %238 = arith.select %235, %233, %237 : vector<16x128xi1>, vector<16x128xf32>
    %c1_108 = arith.constant 1 : index
    %c2_109 = arith.constant 2 : index
    %c0_110 = arith.constant 0 : index
    %c0_111 = arith.constant 0 : index
    %239 = vector.load %arg5[%c1_108, %c2_109, %c0_110, %c0_111] : memref<3x4x16x128xf32, #tpu.memory_space<vmem>>, vector<1x1x16x128xf32>
    %240 = vector.shape_cast %239 : vector<1x1x16x128xf32> to vector<16x128xf32>
    %241 = vector.shape_cast %238 : vector<16x128xf32> to vector<1x1x16x128xf32>
    tpu.vector_store %arg5[%c1_108, %c2_109, %c0_110, %c0_111], %241 {strides = array<i32>} : memref<3x4x16x128xf32, #tpu.memory_space<vmem>>, vector<1x1x16x128xf32>,
    %c7 = arith.constant 7 : index
    %c4_112 = arith.constant 4 : index
    %242 = memref.load %arg3[%c7, %c4_112] : memref<12x5xf32, #tpu.memory_space<smem>>
    %c7_113 = arith.constant 7 : index
    %c0_114 = arith.constant 0 : index
    %243 = memref.load %arg3[%c7_113, %c0_114] : memref<12x5xf32, #tpu.memory_space<smem>>
    %244 = vector.extract_strided_slice %3 {offsets = [0, 0, 0], sizes = [1, 16, 128], strides = [1, 1, 1]} : vector<4x16x128xf32> to vector<1x16x128xf32>
    %245 = vector.shape_cast %244 : vector<1x16x128xf32> to vector<16x128xf32>
    %246 = vector.broadcast %243 : f32 to vector<16x128xf32>
    %247 = arith.mulf %246, %245 : vector<16x128xf32>
    %248 = vector.broadcast %242 : f32 to vector<16x128xf32>
    %249 = arith.addf %248, %247 : vector<16x128xf32>
    %c7_115 = arith.constant 7 : index
    %c1_116 = arith.constant 1 : index
    %250 = memref.load %arg3[%c7_115, %c1_116] : memref<12x5xf32, #tpu.memory_space<smem>>
    %251 = vector.extract_strided_slice %3 {offsets = [1, 0, 0], sizes = [1, 16, 128], strides = [1, 1, 1]} : vector<4x16x128xf32> to vector<1x16x128xf32>
    %252 = vector.shape_cast %251 : vector<1x16x128xf32> to vector<16x128xf32>
    %253 = vector.broadcast %250 : f32 to vector<16x128xf32>
    %254 = arith.mulf %253, %252 : vector<16x128xf32>
    %255 = arith.addf %249, %254 : vector<16x128xf32>
    %c7_117 = arith.constant 7 : index
    %c2_118 = arith.constant 2 : index
    %256 = memref.load %arg3[%c7_117, %c2_118] : memref<12x5xf32, #tpu.memory_space<smem>>
    %257 = vector.extract_strided_slice %3 {offsets = [2, 0, 0], sizes = [1, 16, 128], strides = [1, 1, 1]} : vector<4x16x128xf32> to vector<1x16x128xf32>
    %258 = vector.shape_cast %257 : vector<1x16x128xf32> to vector<16x128xf32>
    %259 = vector.broadcast %256 : f32 to vector<16x128xf32>
    %260 = arith.mulf %259, %258 : vector<16x128xf32>
    %261 = arith.addf %255, %260 : vector<16x128xf32>
    %c7_119 = arith.constant 7 : index
    %c3_120 = arith.constant 3 : index
    %262 = memref.load %arg3[%c7_119, %c3_120] : memref<12x5xf32, #tpu.memory_space<smem>>
    %263 = vector.extract_strided_slice %3 {offsets = [3, 0, 0], sizes = [1, 16, 128], strides = [1, 1, 1]} : vector<4x16x128xf32> to vector<1x16x128xf32>
    %264 = vector.shape_cast %263 : vector<1x16x128xf32> to vector<16x128xf32>
    %265 = vector.broadcast %262 : f32 to vector<16x128xf32>
    %266 = arith.mulf %265, %264 : vector<16x128xf32>
    %267 = arith.addf %261, %266 : vector<16x128xf32>
    %cst_121 = arith.constant 0.000000e+00 : f32
    %268 = vector.broadcast %cst_121 : f32 to vector<16x128xf32>
    %269 = arith.cmpf oge, %267, %268 : vector<16x128xf32>
    %cst_122 = arith.constant 0.00999999977 : f32
    %270 = vector.broadcast %cst_122 : f32 to vector<16x128xf32>
    %271 = arith.mulf %270, %267 : vector<16x128xf32>
    %272 = arith.select %269, %267, %271 : vector<16x128xi1>, vector<16x128xf32>
    %c1_123 = arith.constant 1 : index
    %c3_124 = arith.constant 3 : index
    %c0_125 = arith.constant 0 : index
    %c0_126 = arith.constant 0 : index
    %273 = vector.load %arg5[%c1_123, %c3_124, %c0_125, %c0_126] : memref<3x4x16x128xf32, #tpu.memory_space<vmem>>, vector<1x1x16x128xf32>
    %274 = vector.shape_cast %273 : vector<1x1x16x128xf32> to vector<16x128xf32>
    %275 = vector.shape_cast %272 : vector<16x128xf32> to vector<1x1x16x128xf32>
    tpu.vector_store %arg5[%c1_123, %c3_124, %c0_125, %c0_126], %275 {strides = array<i32>} : memref<3x4x16x128xf32, #tpu.memory_space<vmem>>, vector<1x1x16x128xf32>,
    %c8 = arith.constant 8 : index
    %c4_127 = arith.constant 4 : index
    %276 = memref.load %arg3[%c8, %c4_127] : memref<12x5xf32, #tpu.memory_space<smem>>
    %c8_128 = arith.constant 8 : index
    %c0_129 = arith.constant 0 : index
    %277 = memref.load %arg3[%c8_128, %c0_129] : memref<12x5xf32, #tpu.memory_space<smem>>
    %278 = vector.extract_strided_slice %3 {offsets = [0, 0, 0], sizes = [1, 16, 128], strides = [1, 1, 1]} : vector<4x16x128xf32> to vector<1x16x128xf32>
    %279 = vector.shape_cast %278 : vector<1x16x128xf32> to vector<16x128xf32>
    %280 = vector.broadcast %277 : f32 to vector<16x128xf32>
    %281 = arith.mulf %280, %279 : vector<16x128xf32>
    %282 = vector.broadcast %276 : f32 to vector<16x128xf32>
    %283 = arith.addf %282, %281 : vector<16x128xf32>
    %c8_130 = arith.constant 8 : index
    %c1_131 = arith.constant 1 : index
    %284 = memref.load %arg3[%c8_130, %c1_131] : memref<12x5xf32, #tpu.memory_space<smem>>
    %285 = vector.extract_strided_slice %3 {offsets = [1, 0, 0], sizes = [1, 16, 128], strides = [1, 1, 1]} : vector<4x16x128xf32> to vector<1x16x128xf32>
    %286 = vector.shape_cast %285 : vector<1x16x128xf32> to vector<16x128xf32>
    %287 = vector.broadcast %284 : f32 to vector<16x128xf32>
    %288 = arith.mulf %287, %286 : vector<16x128xf32>
    %289 = arith.addf %283, %288 : vector<16x128xf32>
    %c8_132 = arith.constant 8 : index
    %c2_133 = arith.constant 2 : index
    %290 = memref.load %arg3[%c8_132, %c2_133] : memref<12x5xf32, #tpu.memory_space<smem>>
    %291 = vector.extract_strided_slice %3 {offsets = [2, 0, 0], sizes = [1, 16, 128], strides = [1, 1, 1]} : vector<4x16x128xf32> to vector<1x16x128xf32>
    %292 = vector.shape_cast %291 : vector<1x16x128xf32> to vector<16x128xf32>
    %293 = vector.broadcast %290 : f32 to vector<16x128xf32>
    %294 = arith.mulf %293, %292 : vector<16x128xf32>
    %295 = arith.addf %289, %294 : vector<16x128xf32>
    %c8_134 = arith.constant 8 : index
    %c3_135 = arith.constant 3 : index
    %296 = memref.load %arg3[%c8_134, %c3_135] : memref<12x5xf32, #tpu.memory_space<smem>>
    %297 = vector.extract_strided_slice %3 {offsets = [3, 0, 0], sizes = [1, 16, 128], strides = [1, 1, 1]} : vector<4x16x128xf32> to vector<1x16x128xf32>
    %298 = vector.shape_cast %297 : vector<1x16x128xf32> to vector<16x128xf32>
    %299 = vector.broadcast %296 : f32 to vector<16x128xf32>
    %300 = arith.mulf %299, %298 : vector<16x128xf32>
    %301 = arith.addf %295, %300 : vector<16x128xf32>
    %cst_136 = arith.constant 0.000000e+00 : f32
    %302 = vector.broadcast %cst_136 : f32 to vector<16x128xf32>
    %303 = arith.cmpf oge, %301, %302 : vector<16x128xf32>
    %cst_137 = arith.constant 0.00999999977 : f32
    %304 = vector.broadcast %cst_137 : f32 to vector<16x128xf32>
    %305 = arith.mulf %304, %301 : vector<16x128xf32>
    %306 = arith.select %303, %301, %305 : vector<16x128xi1>, vector<16x128xf32>
    %c2_138 = arith.constant 2 : index
    %c0_139 = arith.constant 0 : index
    %c0_140 = arith.constant 0 : index
    %c0_141 = arith.constant 0 : index
    %307 = vector.load %arg5[%c2_138, %c0_139, %c0_140, %c0_141] : memref<3x4x16x128xf32, #tpu.memory_space<vmem>>, vector<1x1x16x128xf32>
    %308 = vector.shape_cast %307 : vector<1x1x16x128xf32> to vector<16x128xf32>
    %309 = vector.shape_cast %306 : vector<16x128xf32> to vector<1x1x16x128xf32>
    tpu.vector_store %arg5[%c2_138, %c0_139, %c0_140, %c0_141], %309 {strides = array<i32>} : memref<3x4x16x128xf32, #tpu.memory_space<vmem>>, vector<1x1x16x128xf32>,
    %c9 = arith.constant 9 : index
    %c4_142 = arith.constant 4 : index
    %310 = memref.load %arg3[%c9, %c4_142] : memref<12x5xf32, #tpu.memory_space<smem>>
    %c9_143 = arith.constant 9 : index
    %c0_144 = arith.constant 0 : index
    %311 = memref.load %arg3[%c9_143, %c0_144] : memref<12x5xf32, #tpu.memory_space<smem>>
    %312 = vector.extract_strided_slice %3 {offsets = [0, 0, 0], sizes = [1, 16, 128], strides = [1, 1, 1]} : vector<4x16x128xf32> to vector<1x16x128xf32>
    %313 = vector.shape_cast %312 : vector<1x16x128xf32> to vector<16x128xf32>
    %314 = vector.broadcast %311 : f32 to vector<16x128xf32>
    %315 = arith.mulf %314, %313 : vector<16x128xf32>
    %316 = vector.broadcast %310 : f32 to vector<16x128xf32>
    %317 = arith.addf %316, %315 : vector<16x128xf32>
    %c9_145 = arith.constant 9 : index
    %c1_146 = arith.constant 1 : index
    %318 = memref.load %arg3[%c9_145, %c1_146] : memref<12x5xf32, #tpu.memory_space<smem>>
    %319 = vector.extract_strided_slice %3 {offsets = [1, 0, 0], sizes = [1, 16, 128], strides = [1, 1, 1]} : vector<4x16x128xf32> to vector<1x16x128xf32>
    %320 = vector.shape_cast %319 : vector<1x16x128xf32> to vector<16x128xf32>
    %321 = vector.broadcast %318 : f32 to vector<16x128xf32>
    %322 = arith.mulf %321, %320 : vector<16x128xf32>
    %323 = arith.addf %317, %322 : vector<16x128xf32>
    %c9_147 = arith.constant 9 : index
    %c2_148 = arith.constant 2 : index
    %324 = memref.load %arg3[%c9_147, %c2_148] : memref<12x5xf32, #tpu.memory_space<smem>>
    %325 = vector.extract_strided_slice %3 {offsets = [2, 0, 0], sizes = [1, 16, 128], strides = [1, 1, 1]} : vector<4x16x128xf32> to vector<1x16x128xf32>
    %326 = vector.shape_cast %325 : vector<1x16x128xf32> to vector<16x128xf32>
    %327 = vector.broadcast %324 : f32 to vector<16x128xf32>
    %328 = arith.mulf %327, %326 : vector<16x128xf32>
    %329 = arith.addf %323, %328 : vector<16x128xf32>
    %c9_149 = arith.constant 9 : index
    %c3_150 = arith.constant 3 : index
    %330 = memref.load %arg3[%c9_149, %c3_150] : memref<12x5xf32, #tpu.memory_space<smem>>
    %331 = vector.extract_strided_slice %3 {offsets = [3, 0, 0], sizes = [1, 16, 128], strides = [1, 1, 1]} : vector<4x16x128xf32> to vector<1x16x128xf32>
    %332 = vector.shape_cast %331 : vector<1x16x128xf32> to vector<16x128xf32>
    %333 = vector.broadcast %330 : f32 to vector<16x128xf32>
    %334 = arith.mulf %333, %332 : vector<16x128xf32>
    %335 = arith.addf %329, %334 : vector<16x128xf32>
    %cst_151 = arith.constant 0.000000e+00 : f32
    %336 = vector.broadcast %cst_151 : f32 to vector<16x128xf32>
    %337 = arith.cmpf oge, %335, %336 : vector<16x128xf32>
    %cst_152 = arith.constant 0.00999999977 : f32
    %338 = vector.broadcast %cst_152 : f32 to vector<16x128xf32>
    %339 = arith.mulf %338, %335 : vector<16x128xf32>
    %340 = arith.select %337, %335, %339 : vector<16x128xi1>, vector<16x128xf32>
    %c2_153 = arith.constant 2 : index
    %c1_154 = arith.constant 1 : index
    %c0_155 = arith.constant 0 : index
    %c0_156 = arith.constant 0 : index
    %341 = vector.load %arg5[%c2_153, %c1_154, %c0_155, %c0_156] : memref<3x4x16x128xf32, #tpu.memory_space<vmem>>, vector<1x1x16x128xf32>
    %342 = vector.shape_cast %341 : vector<1x1x16x128xf32> to vector<16x128xf32>
    %343 = vector.shape_cast %340 : vector<16x128xf32> to vector<1x1x16x128xf32>
    tpu.vector_store %arg5[%c2_153, %c1_154, %c0_155, %c0_156], %343 {strides = array<i32>} : memref<3x4x16x128xf32, #tpu.memory_space<vmem>>, vector<1x1x16x128xf32>,
    %c10 = arith.constant 10 : index
    %c4_157 = arith.constant 4 : index
    %344 = memref.load %arg3[%c10, %c4_157] : memref<12x5xf32, #tpu.memory_space<smem>>
    %c10_158 = arith.constant 10 : index
    %c0_159 = arith.constant 0 : index
    %345 = memref.load %arg3[%c10_158, %c0_159] : memref<12x5xf32, #tpu.memory_space<smem>>
    %346 = vector.extract_strided_slice %3 {offsets = [0, 0, 0], sizes = [1, 16, 128], strides = [1, 1, 1]} : vector<4x16x128xf32> to vector<1x16x128xf32>
    %347 = vector.shape_cast %346 : vector<1x16x128xf32> to vector<16x128xf32>
    %348 = vector.broadcast %345 : f32 to vector<16x128xf32>
    %349 = arith.mulf %348, %347 : vector<16x128xf32>
    %350 = vector.broadcast %344 : f32 to vector<16x128xf32>
    %351 = arith.addf %350, %349 : vector<16x128xf32>
    %c10_160 = arith.constant 10 : index
    %c1_161 = arith.constant 1 : index
    %352 = memref.load %arg3[%c10_160, %c1_161] : memref<12x5xf32, #tpu.memory_space<smem>>
    %353 = vector.extract_strided_slice %3 {offsets = [1, 0, 0], sizes = [1, 16, 128], strides = [1, 1, 1]} : vector<4x16x128xf32> to vector<1x16x128xf32>
    %354 = vector.shape_cast %353 : vector<1x16x128xf32> to vector<16x128xf32>
    %355 = vector.broadcast %352 : f32 to vector<16x128xf32>
    %356 = arith.mulf %355, %354 : vector<16x128xf32>
    %357 = arith.addf %351, %356 : vector<16x128xf32>
    %c10_162 = arith.constant 10 : index
    %c2_163 = arith.constant 2 : index
    %358 = memref.load %arg3[%c10_162, %c2_163] : memref<12x5xf32, #tpu.memory_space<smem>>
    %359 = vector.extract_strided_slice %3 {offsets = [2, 0, 0], sizes = [1, 16, 128], strides = [1, 1, 1]} : vector<4x16x128xf32> to vector<1x16x128xf32>
    %360 = vector.shape_cast %359 : vector<1x16x128xf32> to vector<16x128xf32>
    %361 = vector.broadcast %358 : f32 to vector<16x128xf32>
    %362 = arith.mulf %361, %360 : vector<16x128xf32>
    %363 = arith.addf %357, %362 : vector<16x128xf32>
    %c10_164 = arith.constant 10 : index
    %c3_165 = arith.constant 3 : index
    %364 = memref.load %arg3[%c10_164, %c3_165] : memref<12x5xf32, #tpu.memory_space<smem>>
    %365 = vector.extract_strided_slice %3 {offsets = [3, 0, 0], sizes = [1, 16, 128], strides = [1, 1, 1]} : vector<4x16x128xf32> to vector<1x16x128xf32>
    %366 = vector.shape_cast %365 : vector<1x16x128xf32> to vector<16x128xf32>
    %367 = vector.broadcast %364 : f32 to vector<16x128xf32>
    %368 = arith.mulf %367, %366 : vector<16x128xf32>
    %369 = arith.addf %363, %368 : vector<16x128xf32>
    %cst_166 = arith.constant 0.000000e+00 : f32
    %370 = vector.broadcast %cst_166 : f32 to vector<16x128xf32>
    %371 = arith.cmpf oge, %369, %370 : vector<16x128xf32>
    %cst_167 = arith.constant 0.00999999977 : f32
    %372 = vector.broadcast %cst_167 : f32 to vector<16x128xf32>
    %373 = arith.mulf %372, %369 : vector<16x128xf32>
    %374 = arith.select %371, %369, %373 : vector<16x128xi1>, vector<16x128xf32>
    %c2_168 = arith.constant 2 : index
    %c2_169 = arith.constant 2 : index
    %c0_170 = arith.constant 0 : index
    %c0_171 = arith.constant 0 : index
    %375 = vector.load %arg5[%c2_168, %c2_169, %c0_170, %c0_171] : memref<3x4x16x128xf32, #tpu.memory_space<vmem>>, vector<1x1x16x128xf32>
    %376 = vector.shape_cast %375 : vector<1x1x16x128xf32> to vector<16x128xf32>
    %377 = vector.shape_cast %374 : vector<16x128xf32> to vector<1x1x16x128xf32>
    tpu.vector_store %arg5[%c2_168, %c2_169, %c0_170, %c0_171], %377 {strides = array<i32>} : memref<3x4x16x128xf32, #tpu.memory_space<vmem>>, vector<1x1x16x128xf32>,
    %c11 = arith.constant 11 : index
    %c4_172 = arith.constant 4 : index
    %378 = memref.load %arg3[%c11, %c4_172] : memref<12x5xf32, #tpu.memory_space<smem>>
    %c11_173 = arith.constant 11 : index
    %c0_174 = arith.constant 0 : index
    %379 = memref.load %arg3[%c11_173, %c0_174] : memref<12x5xf32, #tpu.memory_space<smem>>
    %380 = vector.extract_strided_slice %3 {offsets = [0, 0, 0], sizes = [1, 16, 128], strides = [1, 1, 1]} : vector<4x16x128xf32> to vector<1x16x128xf32>
    %381 = vector.shape_cast %380 : vector<1x16x128xf32> to vector<16x128xf32>
    %382 = vector.broadcast %379 : f32 to vector<16x128xf32>
    %383 = arith.mulf %382, %381 : vector<16x128xf32>
    %384 = vector.broadcast %378 : f32 to vector<16x128xf32>
    %385 = arith.addf %384, %383 : vector<16x128xf32>
    %c11_175 = arith.constant 11 : index
    %c1_176 = arith.constant 1 : index
    %386 = memref.load %arg3[%c11_175, %c1_176] : memref<12x5xf32, #tpu.memory_space<smem>>
    %387 = vector.extract_strided_slice %3 {offsets = [1, 0, 0], sizes = [1, 16, 128], strides = [1, 1, 1]} : vector<4x16x128xf32> to vector<1x16x128xf32>
    %388 = vector.shape_cast %387 : vector<1x16x128xf32> to vector<16x128xf32>
    %389 = vector.broadcast %386 : f32 to vector<16x128xf32>
    %390 = arith.mulf %389, %388 : vector<16x128xf32>
    %391 = arith.addf %385, %390 : vector<16x128xf32>
    %c11_177 = arith.constant 11 : index
    %c2_178 = arith.constant 2 : index
    %392 = memref.load %arg3[%c11_177, %c2_178] : memref<12x5xf32, #tpu.memory_space<smem>>
    %393 = vector.extract_strided_slice %3 {offsets = [2, 0, 0], sizes = [1, 16, 128], strides = [1, 1, 1]} : vector<4x16x128xf32> to vector<1x16x128xf32>
    %394 = vector.shape_cast %393 : vector<1x16x128xf32> to vector<16x128xf32>
    %395 = vector.broadcast %392 : f32 to vector<16x128xf32>
    %396 = arith.mulf %395, %394 : vector<16x128xf32>
    %397 = arith.addf %391, %396 : vector<16x128xf32>
    %c11_179 = arith.constant 11 : index
    %c3_180 = arith.constant 3 : index
    %398 = memref.load %arg3[%c11_179, %c3_180] : memref<12x5xf32, #tpu.memory_space<smem>>
    %399 = vector.extract_strided_slice %3 {offsets = [3, 0, 0], sizes = [1, 16, 128], strides = [1, 1, 1]} : vector<4x16x128xf32> to vector<1x16x128xf32>
    %400 = vector.shape_cast %399 : vector<1x16x128xf32> to vector<16x128xf32>
    %401 = vector.broadcast %398 : f32 to vector<16x128xf32>
    %402 = arith.mulf %401, %400 : vector<16x128xf32>
    %403 = arith.addf %397, %402 : vector<16x128xf32>
    %cst_181 = arith.constant 0.000000e+00 : f32
    %404 = vector.broadcast %cst_181 : f32 to vector<16x128xf32>
    %405 = arith.cmpf oge, %403, %404 : vector<16x128xf32>
    %cst_182 = arith.constant 0.00999999977 : f32
    %406 = vector.broadcast %cst_182 : f32 to vector<16x128xf32>
    %407 = arith.mulf %406, %403 : vector<16x128xf32>
    %408 = arith.select %405, %403, %407 : vector<16x128xi1>, vector<16x128xf32>
    %c2_183 = arith.constant 2 : index
    %c3_184 = arith.constant 3 : index
    %c0_185 = arith.constant 0 : index
    %c0_186 = arith.constant 0 : index
    %409 = vector.load %arg5[%c2_183, %c3_184, %c0_185, %c0_186] : memref<3x4x16x128xf32, #tpu.memory_space<vmem>>, vector<1x1x16x128xf32>
    %410 = vector.shape_cast %409 : vector<1x1x16x128xf32> to vector<16x128xf32>
    %411 = vector.shape_cast %408 : vector<16x128xf32> to vector<1x1x16x128xf32>
    tpu.vector_store %arg5[%c2_183, %c3_184, %c0_185, %c0_186], %411 {strides = array<i32>} : memref<3x4x16x128xf32, #tpu.memory_space<vmem>>, vector<1x1x16x128xf32>,
    %c0_187 = arith.constant 0 : index
    %c0_188 = arith.constant 0 : index
    %c0_189 = arith.constant 0 : index
    %c0_190 = arith.constant 0 : index
    %412 = vector.load %arg5[%c0_187, %c0_188, %c0_189, %c0_190] : memref<3x4x16x128xf32, #tpu.memory_space<vmem>>, vector<1x4x16x128xf32>
    %413 = vector.shape_cast %412 : vector<1x4x16x128xf32> to vector<4x16x128xf32>
    %c1_191 = arith.constant 1 : index
    %c0_192 = arith.constant 0 : index
    %c0_193 = arith.constant 0 : index
    %c0_194 = arith.constant 0 : index
    %414 = vector.load %arg5[%c1_191, %c0_192, %c0_193, %c0_194] : memref<3x4x16x128xf32, #tpu.memory_space<vmem>>, vector<1x4x16x128xf32>
    %415 = vector.shape_cast %414 : vector<1x4x16x128xf32> to vector<4x16x128xf32>
    %c2_195 = arith.constant 2 : index
    %c0_196 = arith.constant 0 : index
    %c0_197 = arith.constant 0 : index
    %c0_198 = arith.constant 0 : index
    %416 = vector.load %arg5[%c2_195, %c0_196, %c0_197, %c0_198] : memref<3x4x16x128xf32, #tpu.memory_space<vmem>>, vector<1x4x16x128xf32>
    %417 = vector.shape_cast %416 : vector<1x4x16x128xf32> to vector<4x16x128xf32>
    %cst_199 = arith.constant dense<0.000000e+00> : vector<4x16x16xf32>
    %418 = tpu.matmul %413, %415, %cst_199 {dimension_numbers = #tpu.dot_dimension_numbers<[2], [2], [1], [1], [0, 0, 0, 1, 1, 1], [0], [0]>} : vector<4x16x128xf32>, vector<4x16x128xf32>, vector<4x16x16xf32> -> vector<4x16x16xf32>
    %cst_200 = arith.constant dense<0.000000e+00> : vector<16x16xf32>
    %419 = vector.multi_reduction <add>, %418, %cst_200 [0] : vector<4x16x16xf32> to vector<16x16xf32>
    %cst_201 = arith.constant dense<0xFF800000> : vector<16xf32>
    %420 = vector.multi_reduction <maximumf>, %419, %cst_201 [0] : vector<16x16xf32> to vector<16xf32>
    %421 = vector.shape_cast %420 : vector<16xf32> to vector<1x16xf32>
    %422 = vector.broadcast %421 : vector<1x16xf32> to vector<16x16xf32>
    %423 = arith.subf %419, %422 : vector<16x16xf32>
    %424 = math.exp %423 : vector<16x16xf32>
    %cst_202 = arith.constant dense<0.000000e+00> : vector<16xf32>
    %425 = vector.multi_reduction <add>, %424, %cst_202 [0] : vector<16x16xf32> to vector<16xf32>
    %426 = vector.shape_cast %425 : vector<16xf32> to vector<1x16xf32>
    %427 = tpu.reciprocal %426 {approx = true} : vector<1x16xf32> -> vector<1x16xf32>
    %428 = vector.broadcast %427 : vector<1x16xf32> to vector<16x16xf32>
    %429 = arith.mulf %424, %428 : vector<16x16xf32>
    %430 = vector.shape_cast %429 : vector<16x16xf32> to vector<1x16x16xf32>
    %431 = vector.shape_cast %430 : vector<1x16x16xf32> to vector<1x16x16xf32>
    %432 = vector.broadcast %431 : vector<1x16x16xf32> to vector<4x16x16xf32>
    %cst_203 = arith.constant dense<0.000000e+00> : vector<4x16x128xf32>
    %433 = tpu.matmul %432, %417, %cst_203 {dimension_numbers = #tpu.dot_dimension_numbers<[2], [1], [1], [2], [0, 0, 0, 1, 1, 2], [0], [0]>} : vector<4x16x16xf32>, vector<4x16x128xf32>, vector<4x16x128xf32> -> vector<4x16x128xf32>
    %c0_204 = arith.constant 0 : index
    %c0_205 = arith.constant 0 : index
    %c0_206 = arith.constant 0 : index
    %c0_207 = arith.constant 0 : index
    %434 = vector.load %arg4[%c0_204, %c0_205, %c0_206, %c0_207] : memref<1x4x16x128xf32, #tpu.memory_space<vmem>>, vector<1x4x16x128xf32>
    %435 = vector.shape_cast %434 : vector<1x4x16x128xf32> to vector<4x16x128xf32>
    %436 = vector.shape_cast %433 : vector<4x16x128xf32> to vector<1x4x16x128xf32>
    tpu.vector_store %arg4[%c0_204, %c0_205, %c0_206, %c0_207], %436 {strides = array<i32>} : memref<1x4x16x128xf32, #tpu.memory_space<vmem>>, vector<1x4x16x128xf32>,
    return
  }
  func.func @transform_0(%arg0: i32) -> (i32, i32, i32, i32) {
    %c0_i32 = arith.constant 0 : i32
    %c0_i32_0 = arith.constant 0 : i32
    %c0_i32_1 = arith.constant 0 : i32
    %c0_i32_2 = arith.constant 0 : i32
    return %arg0, %c0_i32, %c0_i32_0, %c0_i32_1 : i32, i32, i32, i32
  }
  func.func @transform_1(%arg0: i32) -> (i32, i32, i32, i32) {
    %c0_i32 = arith.constant 0 : i32
    %c0_i32_0 = arith.constant 0 : i32
    %c0_i32_1 = arith.constant 0 : i32
    %c0_i32_2 = arith.constant 0 : i32
    return %arg0, %c0_i32, %c0_i32_0, %c0_i32_1 : i32, i32, i32, i32
  }
  func.func @transform_2(%arg0: i32) -> (i32, i32) {
    %c0_i32 = arith.constant 0 : i32
    %c0_i32_0 = arith.constant 0 : i32
    %c0_i32_1 = arith.constant 0 : i32
    return %c0_i32, %c0_i32_0 : i32, i32
  }
  func.func @transform_3(%arg0: i32) -> (i32, i32, i32, i32) {
    %c0_i32 = arith.constant 0 : i32
    %c0_i32_0 = arith.constant 0 : i32
    %c0_i32_1 = arith.constant 0 : i32
    %c0_i32_2 = arith.constant 0 : i32
    return %arg0, %c0_i32, %c0_i32_0, %c0_i32_1 : i32, i32, i32, i32
  }
}

</mosaic_0001>

<bundles_post_ra>
// kernel: self_attention_freq.2
= control target key start
LH: loop header
LB: loop body
LE: loop exit
PB: predicated region body
PF: predicated region fallthrough
CT: control target
= control target key end

     0   :  { %s1886_s21 = smov 0   ;;  %s2071_s0 = inlined_call_operand.vmem [shape: f32[2,4,2048], index: 0, kind: input, shape index: {}]   ;;  %s2072_s1 = inlined_call_operand.vmem [shape: f32[2,4,2048], index: 1, kind: input, shape index: {}]   ;;  %s2073_s2 = inlined_call_operand.vmem [shape: f32[4,4], index: 2, kind: input, shape index: {}]   ;;  %s2074_s3 = inlined_call_operand.vmem [shape: f32[4,1], index: 3, kind: input, shape index: {}]   ;;  %s2075_s4 = inlined_call_operand.vmem [shape: f32[8,4], index: 4, kind: input, shape index: {}]   ;;  %s2076_s5 = inlined_call_operand.vmem [shape: f32[8,1], index: 5, kind: input, shape index: {}]   ;;  %s2077_s6 = inlined_call_operand.vmem [shape: f32[2,2,12,1], index: 6, kind: output, shape index: {}]  }
   0x1 LB: > { %s1748_s22 = sadd.s32 4294967295, %s1847_s21   ;;  %p1752_p0 = scmp.ge.s32.totalorder %s1847_s21, 1  ;;  %s1847_s21 = sphi %s1886_s21, %s16_s21  }
   0x2   : > { %p222_p1 = scmp.lt.s32.totalorder %s1847_s21, 3 }
   0x4   : > { %p223_p2 = pnand %p1752_p0, %p222_p1 }
   0x5   : > { %p257_p3 = scmp.lt.s32.totalorder (!%p223_p2), %s1748_s22, 1 }
   0x6   : > { %226 = sbr.rel (%p223_p2) target bundleno = 405 (0x195), region = 44 }
   0xb   : > { %v1849_v0 = vmov 0.0   ;;  %v289_v1 = vld [vmem:[%s2074_s3] sm:$0xf]  ;;  %s2079_s22 = smov (!%p257_p3, %s1748_s22), 1  ;;  %v1850_v2 = vmov 0   ;;  %vm315_vm0 = vcmask 1043456  }
   0xc   : > { %412 = vmatprep.mubr.f32.mxu0 %v1849_v0  ;;  %483 = vmatprep.mubr.f32.mxu1 %v1849_v0  ;;  %s1811_s25 = sshll.u32 %s2079_s22, 6  ;;  %v917_v3 = vld [vmem:[%s2076_s5] sm:$0xff]  ;;  %vm311_vm1 = vcmask 31744   ;;  %s1813_s14 = sshll.u32 %s2079_s22, 5  ;;  %vm1575_vm2 = vcmask 3072   ;;  %vm1594_vm3 = vcmask 7168  }
   0xd   : > { %1824 = vset.pattern.permute.xlu0 %v1850_v2  ;;  %s261_s30 = scalar_lea.vmem %s2071_s0, %s1811_s25  ;;  %v288_v10 = vld [vmem:[%s2073_s2] sm:$0xf]  ;;  %s1928_s11 = scalar_lea.vmem %s2072_s1, %s1811_s25 }
   0xe   : > { %292 = vperm.xlu0 %1824, %v289_v1   ;;  %v272_v4 = vld [vmem:[%s261_s30] sm:$0xff]  ;;  %v273_v5 = vld [vmem:[%s261_s30 + $0x8] sm:$0xff]  ;;  %v274_v6 = vld [vmem:[%s261_s30 + $0x10] sm:$0xff]  ;;  %s271_s17 = scalar_lea.vmem %s2077_s6, %s1813_s14 }
   0xf   : > { %v303_v7 = vcombine.high %v272_v4, %v272_v4  ;;  %v304_v8 = vcombine.high %v273_v5, %v273_v5  ;;  %v275_v9 = vld [vmem:[%s261_s30 + $0x18] sm:$0xff]  ;;  %v305_v11 = vcombine.high %v274_v6, %v274_v6  ;;  %v276_v13 = vld [vmem:[%s261_s30 + $0x20] sm:$0xff]  ;;  %v277_v14 = vld [vmem:[%s261_s30 + $0x28] sm:$0xff] }
  0x10   : > { %v306_v12 = vcombine.high %v275_v9, %v275_v9  ;;  %v307_v15 = vcombine.high %v276_v13, %v276_v13  ;;  %v308_v16 = vcombine.high %v277_v14, %v277_v14  ;;  %v278_v17 = vld [vmem:[%s261_s30 + $0x30] sm:$0xff]  ;;  %v279_v18 = vld [vmem:[%s261_s30 + $0x38] sm:$0xff]  ;;  %v280_v21 = vld [vmem:[%s1928_s11] sm:$0xff] }
  0x11   : > { %1759 = vmatprep.subr.msk.mxu0 %vm315_vm0, %v303_v7  ;;  %1762 = vmatprep.subr.msk.mxu1 %vm315_vm0, %v304_v8  ;;  %v309_v19 = vcombine.high %v278_v17, %v278_v17  ;;  %v310_v20 = vcombine.high %v279_v18, %v279_v18  ;;  %v281_v22 = vld [vmem:[%s1928_s11 + $0x8] sm:$0xff]  ;;  %v931_v23 = vcombine.high %v280_v21, %v280_v21  ;;  %v282_v25 = vld [vmem:[%s1928_s11 + $0x10] sm:$0xff]  ;;  %v283_v26 = vld [vmem:[%s1928_s11 + $0x18] sm:$0xff] }
  0x12   : > { %920 = vperm.xlu0 %1824, %v917_v3   ;;  %1760 = vmatpush1.msk.msra.mxu0 %vm315_vm0, %v272_v4  ;;  %v932_v24 = vcombine.high %v281_v22, %v281_v22  ;;  %v916_v27 = vld [vmem:[%s2075_s4] sm:$0xff]  ;;  %v933_v28 = vcombine.high %v282_v25, %v282_v25  ;;  %v934_v29 = vcombine.high %v283_v26, %v283_v26  ;;  %v285_v31 = vld [vmem:[%s1928_s11 + $0x28] sm:$0xff]  ;;  %v286_v34 = vld [vmem:[%s1928_s11 + $0x30] sm:$0xff] }
  0x13   : > { %1763 = vmatpush1.msk.msra.mxu1 %vm315_vm0, %v273_v5  ;;  %1761 = vmatmul.mubr.msk.f32.vlgmr.msra.gmra.mxu0 %vm311_vm1, %v288_v10  ;;  %v284_v30 = vld [vmem:[%s1928_s11 + $0x20] sm:$0xff]  ;;  %v936_v33 = vcombine.high %v285_v31, %v285_v31  ;;  %v287_v35 = vld [vmem:[%s1928_s11 + $0x38] sm:$0xff]  ;;  %v937_v36 = vcombine.high %v286_v34, %v286_v34 }
  0x14   : > { %1764 = vmatmul.mubr.msk.f32.vlgmr.msra.gmra.mxu1 %vm311_vm1, %v288_v10  ;;  %1765 = vmatprep.subr.msk.mxu0 %vm315_vm0, %v305_v11  ;;  %v935_v32 = vcombine.high %v284_v30, %v284_v30  ;;  %v938_v37 = vcombine.high %v287_v35, %v287_v35 }
  0x15   : > { %1768 = vmatprep.subr.msk.mxu1 %vm315_vm0, %v306_v12  ;;  %1766 = vmatpush1.msk.msra.mxu0 %vm315_vm0, %v274_v6 }
  0x16   : > { %554 = vmatprep.mubr.f32.mxu0 %v1849_v0  ;;  %1769 = vmatpush1.msk.msra.mxu1 %vm315_vm0, %v275_v9 }
  0x17   : > { %625 = vmatprep.mubr.f32.mxu1 %v1849_v0  ;;  %1767 = vmatmul.mubr.msk.f32.vlgmr.msra.gmra.mxu0 %vm311_vm1, %v288_v10 }
  0x18   : > { %1770 = vmatmul.mubr.msk.f32.vlgmr.msra.gmra.mxu1 %vm311_vm1, %v288_v10  ;;  %1771 = vmatprep.subr.msk.mxu0 %vm315_vm0, %v307_v15 }
  0x19   : > { %1774 = vmatprep.subr.msk.mxu1 %vm315_vm0, %v308_v16  ;;  %1772 = vmatpush1.msk.msra.mxu0 %vm315_vm0, %v276_v13 }
  0x1a   : > { %696 = vmatprep.mubr.f32.mxu0 %v1849_v0  ;;  %1775 = vmatpush1.msk.msra.mxu1 %vm315_vm0, %v277_v14 }
  0x1b   : > { %767 = vmatprep.mubr.f32.mxu1 %v1849_v0  ;;  %1773 = vmatmul.mubr.msk.f32.vlgmr.msra.gmra.mxu0 %vm311_vm1, %v288_v10 }
  0x1c   : > { %1776 = vmatmul.mubr.msk.f32.vlgmr.msra.gmra.mxu1 %vm311_vm1, %v288_v10  ;;  %1777 = vmatprep.subr.msk.mxu0 %vm315_vm0, %v309_v19 }
  0x1d   : > { %1780 = vmatprep.subr.msk.mxu1 %vm315_vm0, %v310_v20  ;;  %1778 = vmatpush1.msk.msra.mxu0 %vm315_vm0, %v278_v17 }
  0x1e   : > { %838 = vmatprep.mubr.f32.mxu0 %v1849_v0  ;;  %1781 = vmatpush1.msk.msra.mxu1 %vm315_vm0, %v279_v18 }
  0x1f   : > { %909 = vmatprep.mubr.f32.mxu1 %v1849_v0  ;;  %1779 = vmatmul.mubr.msk.f32.vlgmr.msra.gmra.mxu0 %vm311_vm1, %v288_v10 }
  0x20   : > { %1782 = vmatmul.mubr.msk.f32.vlgmr.msra.gmra.mxu1 %vm311_vm1, %v288_v10  ;;  %1783 = vmatprep.subr.msk.mxu0 %vm315_vm0, %v931_v23 }
  0x21   : > { %1786 = vmatprep.subr.msk.mxu1 %vm315_vm0, %v932_v24  ;;  %1784 = vmatpush1.msk.msra.mxu0 %vm315_vm0, %v280_v21 }
  0x22   : > { %1038 = vmatprep.mubr.f32.mxu0 %v1849_v0  ;;  %1787 = vmatpush1.msk.msra.mxu1 %vm315_vm0, %v281_v22 }
  0x23   : > { %1109 = vmatprep.mubr.f32.mxu1 %v1849_v0  ;;  %1785 = vmatmul.mubr.msk.f32.vlgmr.msra.gmra.mxu0 %vm311_vm1, %v916_v27 }
  0x24   : > { %1788 = vmatmul.mubr.msk.f32.vlgmr.msra.gmra.mxu1 %vm311_vm1, %v916_v27  ;;  %1789 = vmatprep.subr.msk.mxu0 %vm315_vm0, %v933_v28 }
  0x25   : > { %1792 = vmatprep.subr.msk.mxu1 %vm315_vm0, %v934_v29  ;;  %1790 = vmatpush1.msk.msra.mxu0 %vm315_vm0, %v282_v25 }
  0x26   : > { %1180 = vmatprep.mubr.f32.mxu0 %v1849_v0  ;;  %1793 = vmatpush1.msk.msra.mxu1 %vm315_vm0, %v283_v26 }
  0x27   : > { %1251 = vmatprep.mubr.f32.mxu1 %v1849_v0  ;;  %1791 = vmatmul.mubr.msk.f32.vlgmr.msra.gmra.mxu0 %vm311_vm1, %v916_v27 }
  0x28   : > { %1794 = vmatmul.mubr.msk.f32.vlgmr.msra.gmra.mxu1 %vm311_vm1, %v916_v27  ;;  %1795 = vmatprep.subr.msk.mxu0 %vm315_vm0, %v935_v32 }
  0x29   : > { %1798 = vmatprep.subr.msk.mxu1 %vm315_vm0, %v936_v33  ;;  %1796 = vmatpush1.msk.msra.mxu0 %vm315_vm0, %v284_v30 }
  0x2a   : > { %1322 = vmatprep.mubr.f32.mxu0 %v1849_v0  ;;  %1799 = vmatpush1.msk.msra.mxu1 %vm315_vm0, %v285_v31 }
  0x2b   : > { %1393 = vmatprep.mubr.f32.mxu1 %v1849_v0  ;;  %1797 = vmatmul.mubr.msk.f32.vlgmr.msra.gmra.mxu0 %vm311_vm1, %v916_v27 }
  0x2c   : > { %1800 = vmatmul.mubr.msk.f32.vlgmr.msra.gmra.mxu1 %vm311_vm1, %v916_v27  ;;  %1801 = vmatprep.subr.msk.mxu0 %vm315_vm0, %v937_v36 }
  0x2d   : > { %1804 = vmatprep.subr.msk.mxu1 %vm315_vm0, %v938_v37  ;;  %1802 = vmatpush1.msk.msra.mxu0 %vm315_vm0, %v286_v34 }
  0x2e   : > { %1464 = vmatprep.mubr.f32.mxu0 %v1849_v0  ;;  %1805 = vmatpush1.msk.msra.mxu1 %vm315_vm0, %v287_v35 }
  0x2f   : > { %1535 = vmatprep.mubr.f32.mxu1 %v1849_v0  ;;  %1803 = vmatmul.mubr.msk.f32.vlgmr.msra.gmra.mxu0 %vm311_vm1, %v916_v27 }
  0x30   : > { %1806 = vmatmul.mubr.msk.f32.vlgmr.msra.gmra.mxu1 %vm311_vm1, %v916_v27 }
  0x89   : > { %v1993_v38 = vpop.permute.xlu0 %292 }
  0xd3   : > { %v414_v39 = vpop.f32.mrf.mxu0 }
  0xd4   : > { %v485_v40 = vpop.f32.mrf.mxu1  ;;  %v415_v41 = vadd.f32 %v414_v39, %v1993_v38 }
  0xd5   : > { %v486_v42 = vadd.f32 %v485_v40, %v1993_v38  ;;  %v416_v43 = vpop.f32.mrf.mxu0 }
  0xd6   : > { %v487_v44 = vpop.f32.mrf.mxu1  ;;  %v417_v45 = vadd.f32 %v416_v43, %v1993_v38  ;;  %v1596_v46 = vmul.f32 %v415_v41, %v415_v41  ;;  %v1542_v51 = vsel %vm315_vm0, %v415_v41, 0.0 }
  0xd7   : > { %v488_v47 = vadd.f32 %v487_v44, %v1993_v38  ;;  %v1598_v48 = vmul.f32 %v486_v42, %v486_v42  ;;  %v556_v49 = vpop.f32.mrf.mxu0  ;;  %v1545_v54 = vsel %vm315_vm0, %v486_v42, 0.0 }
  0xd8   : > { %v627_v50 = vpop.f32.mrf.mxu1  ;;  %v1543_v52 = vsel %vm315_vm0, %v417_v45, 0.0  ;;  %v1597_v53 = vmul.f32 %v417_v45, %v417_v45  ;;  %v1612_v56 = vsel %vm315_vm0, %v1596_v46, 0.0  ;;  %v557_v57 = vadd.f32 %v556_v49, %v1993_v38 }
  0xd9   : > { %v1544_v55 = vadd.f32 %v1543_v52, %v1542_v51  ;;  %v558_v58 = vpop.f32.mrf.mxu0  ;;  %v1599_v61 = vmul.f32 %v488_v47, %v488_v47  ;;  %v1615_v62 = vsel %vm315_vm0, %v1598_v48, 0.0  ;;  %v1547_v4 = vsel %vm315_vm0, %v488_v47, 0.0  ;;  %v2029_v51 = vpop.permute.xlu0 %920 }
  0xda   : > { %v629_v59 = vpop.f32.mrf.mxu1  ;;  %v1613_v60 = vsel %vm315_vm0, %v1597_v53, 0.0  ;;  %v559_v63 = vadd.f32 %v558_v58, %v1993_v38  ;;  %v1600_v5 = vmul.f32 %v557_v57, %v557_v57  ;;  %v628_v6 = vadd.f32 %v627_v50, %v1993_v38 }
  0xdb   : > { %v1614_v0 = vadd.f32 %v1613_v60, %v1612_v56  ;;  %v1546_v1 = vadd.f32 %v1545_v54, %v1544_v55  ;;  %v698_v2 = vpop.f32.mrf.mxu0  ;;  %v630_v9 = vadd.f32 %v629_v59, %v1993_v38  ;;  %v1617_v12 = vsel %vm315_vm0, %v1599_v61, 0.0 }
  0xdc   : > { %v769_v3 = vpop.f32.mrf.mxu1  ;;  %v1549_v13 = vsel %vm315_vm0, %v557_v57, 0.0  ;;  %v1601_v14 = vmul.f32 %v559_v63, %v559_v63  ;;  %v699_v15 = vadd.f32 %v698_v2, %v1993_v38  ;;  %v1619_v21 = vsel %vm315_vm0, %v1600_v5, 0.0 }
  0xdd   : > { %v1548_v7 = vadd.f32 %v1547_v4, %v1546_v1  ;;  %v1616_v8 = vadd.f32 %v1615_v62, %v1614_v0  ;;  %v700_v10 = vpop.f32.mrf.mxu0  ;;  %v770_v18 = vadd.f32 %v769_v3, %v1993_v38  ;;  %v1602_v22 = vmul.f32 %v628_v6, %v628_v6 }
  0xde   : > { %v771_v11 = vpop.f32.mrf.mxu1  ;;  %v1551_v23 = vsel %vm315_vm0, %v559_v63, 0.0  ;;  %v701_v24 = vadd.f32 %v700_v10, %v1993_v38  ;;  %v1603_v27 = vmul.f32 %v630_v9, %v630_v9  ;;  %v1553_v30 = vsel %vm315_vm0, %v628_v6, 0.0 }
  0xdf   : > { %v1618_v16 = vadd.f32 %v1617_v12, %v1616_v8  ;;  %v1550_v17 = vadd.f32 %v1549_v13, %v1548_v7  ;;  %v840_v19 = vpop.f32.mrf.mxu0  ;;  %v1621_v31 = vsel %vm315_vm0, %v1601_v14, 0.0  ;;  %v1604_v32 = vmul.f32 %v699_v15, %v699_v15 }
  0xe0   : > { %v911_v20 = vpop.f32.mrf.mxu1  ;;  %v1606_v35 = vmul.f32 %v770_v18, %v770_v18  ;;  %v1623_v39 = vsel %vm315_vm0, %v1602_v22, 0.0  ;;  %v1555_v40 = vsel %vm315_vm0, %v630_v9, 0.0  ;;  %v1605_v41 = vmul.f32 %v701_v24, %v701_v24 }
  0xe1   : > { %v1620_v25 = vadd.f32 %v1619_v21, %v1618_v16  ;;  %v1552_v26 = vadd.f32 %v1551_v23, %v1550_v17  ;;  %v842_v28 = vpop.f32.mrf.mxu0  ;;  %v772_v42 = vadd.f32 %v771_v11, %v1993_v38  ;;  %v1625_v45 = vsel %vm315_vm0, %v1603_v27, 0.0 }
  0xe2   : > { %v2017_v29 = vpop.f32.mrf.mxu1  ;;  %v1557_v47 = vsel %vm315_vm0, %v699_v15, 0.0  ;;  %v1627_v48 = vsel %vm315_vm0, %v1604_v32, 0.0  ;;  %v1561_v49 = vsel %vm315_vm0, %v770_v18, 0.0  ;;  %v841_v50 = vadd.f32 %v840_v19, %v1993_v38 }
  0xe3   : > { %v1622_v33 = vadd.f32 %v1621_v31, %v1620_v25  ;;  %v1554_v34 = vadd.f32 %v1553_v30, %v1552_v26  ;;  %v1040_v36 = vpop.f32.mrf.mxu0  ;;  %v1631_v54 = vsel %vm315_vm0, %v1606_v35, 0.0  ;;  %v1559_v55 = vsel %vm315_vm0, %v701_v24, 0.0 }
  0xe4   : > { %v1111_v37 = vpop.f32.mrf.mxu1  ;;  %v1629_v58 = vsel %vm315_vm0, %v1605_v41, 0.0  ;;  %v1563_v59 = vsel %vm315_vm0, %v772_v42, 0.0  ;;  %v1041_v60 = vadd.f32 %v1040_v36, %v2029_v51  ;;  %v1607_v0 = vmul.f32 %v772_v42, %v772_v42 }
  0xe5   : > { %v1556_v43 = vadd.f32 %v1555_v40, %v1554_v34  ;;  %v1624_v44 = vadd.f32 %v1623_v39, %v1622_v33  ;;  %v1042_v46 = vpop.f32.mrf.mxu0  ;;  %v1112_v61 = vadd.f32 %v1111_v37, %v2029_v51  ;;  %v1608_v2 = vmul.f32 %v841_v50, %v841_v50 }
  0xe6   : > { %v1113_v56 = vpop.f32.mrf.mxu1  ;;  %v1043_v1 = vadd.f32 %v1042_v46, %v2029_v51  ;;  %v912_v3 = vadd.f32 %v911_v20, %v1993_v38  ;;  %v1647_v4 = vmul.f32 %v1041_v60, %v1041_v60  ;;  %v1565_v12 = vsel %vm315_vm0, %v841_v50, 0.0 }
  0xe7   : > { %v1626_v52 = vadd.f32 %v1625_v45, %v1624_v44  ;;  %v1558_v53 = vadd.f32 %v1557_v47, %v1556_v43  ;;  %v1182_v57 = vpop.f32.mrf.mxu0  ;;  %v1114_v5 = vadd.f32 %v1113_v56, %v2029_v51  ;;  %v843_v13 = vadd.f32 %v842_v28, %v1993_v38 }
  0xe8   : > { %v1577_v8 = vadd.f32 %v1043_v1, %v1041_v60  ;;  %v1648_v9 = vmul.f32 %v1043_v1, %v1043_v1  ;;  %v1253_v10 = vpop.f32.mrf.mxu1  ;;  %v1649_v14 = vmul.f32 %v1112_v61, %v1112_v61  ;;  %v1183_v15 = vadd.f32 %v1182_v57, %v2029_v51 }
  0xe9   : > { %v1628_v62 = vadd.f32 %v1627_v48, %v1626_v52  ;;  %v1560_v63 = vadd.f32 %v1559_v55, %v1558_v53  ;;  %v1184_v11 = vpop.f32.mrf.mxu0  ;;  %v1633_v20 = vsel %vm315_vm0, %v1607_v0, 0.0  ;;  %v1635_v21 = vsel %vm315_vm0, %v1608_v2, 0.0 }
  0xea   : > { %v1663_v18 = vadd.f32 %v1648_v9, %v1647_v4  ;;  %v1578_v19 = vadd.f32 %v1577_v8, %v1112_v61  ;;  %v1650_v22 = vmul.f32 %v1114_v5, %v1114_v5  ;;  %v1185_v23 = vadd.f32 %v1184_v11, %v2029_v51  ;;  %v1255_v30 = vpop.f32.mrf.mxu1 }
  0xeb   : > { %v1630_v6 = vadd.f32 %v1629_v58, %v1628_v62  ;;  %v1562_v7 = vadd.f32 %v1561_v49, %v1560_v63  ;;  %v1324_v28 = vpop.f32.mrf.mxu0  ;;  %v1567_v31 = vsel %vm315_vm0, %v843_v13, 0.0  ;;  %v1609_v32 = vmul.f32 %v843_v13, %v843_v13 }
  0xec   : > { %v1579_v26 = vadd.f32 %v1578_v19, %v1114_v5  ;;  %v1664_v27 = vadd.f32 %v1663_v18, %v1649_v14  ;;  %v914_v33 = vadd.f32 %v2017_v29, %v1993_v38  ;;  %v1254_v34 = vadd.f32 %v1253_v10, %v2029_v51  ;;  %v1395_v38 = vpop.f32.mrf.mxu1 }
  0xed   : > { %v1564_v16 = vadd.f32 %v1563_v59, %v1562_v7  ;;  %v1632_v17 = vadd.f32 %v1631_v54, %v1630_v6  ;;  %v1651_v39 = vmul.f32 %v1183_v15, %v1183_v15  ;;  %v1569_v41 = vsel %vm315_vm0, %v912_v3, 0.0  ;;  %v1326_v47 = vpop.f32.mrf.mxu0 }
  0xee   : > { %v1665_v36 = vadd.f32 %v1664_v27, %v1650_v22  ;;  %v1580_v37 = vadd.f32 %v1579_v26, %v1183_v15  ;;  %v1256_v42 = vadd.f32 %v1255_v30, %v2029_v51  ;;  %v1610_v43 = vmul.f32 %v912_v3, %v912_v3  ;;  %v1397_v0 = vpop.f32.mrf.mxu1 }
  0xef   : > { %v1634_v24 = vadd.f32 %v1633_v20, %v1632_v17  ;;  %v1566_v25 = vadd.f32 %v1565_v12, %v1564_v16  ;;  %v1652_v46 = vmul.f32 %v1185_v23, %v1185_v23  ;;  %v1637_v48 = vsel %vm315_vm0, %v1609_v32, 0.0  ;;  %v1466_v1 = vpop.f32.mrf.mxu0 }
  0xf0   : > { %v1666_v44 = vadd.f32 %v1665_v36, %v1651_v39  ;;  %v1581_v45 = vadd.f32 %v1580_v37, %v1185_v23  ;;  %v1611_v49 = vmul.f32 %v914_v33, %v914_v33  ;;  %v1653_v50 = vmul.f32 %v1254_v34, %v1254_v34  ;;  %v1537_v17 = vpop.f32.mrf.mxu1 }
  0xf1   : > { %v1568_v35 = vadd.f32 %v1567_v31, %v1566_v25  ;;  %v1636_v40 = vadd.f32 %v1635_v21, %v1634_v24  ;;  %v1325_v54 = vadd.f32 %v1324_v28, %v2029_v51  ;;  %v1654_v55 = vmul.f32 %v1256_v42, %v1256_v42  ;;  %v1468_v12 = vpop.f32.mrf.mxu0 }
  0xf2   : > { %v1667_v52 = vadd.f32 %v1666_v44, %v1652_v46  ;;  %v1582_v53 = vadd.f32 %v1581_v45, %v1254_v34  ;;  %v1327_v56 = vadd.f32 %v1326_v47, %v2029_v51  ;;  %v1571_v57 = vsel %vm315_vm0, %v914_v33, 0.0  ;;  %v1539_v26 = vpop.f32.mrf.mxu1 }
  0xf3   : > { %v1570_v29 = vadd.f32 %v1569_v41, %v1568_v35  ;;  %v1638_v58 = vadd.f32 %v1637_v48, %v1636_v40  ;;  %v1639_v62 = vsel %vm315_vm0, %v1610_v43, 0.0  ;;  %v1396_v63 = vadd.f32 %v1395_v38, %v2029_v51 }
  0xf4   : > { %v1583_v59 = vadd.f32 %v1582_v53, %v1256_v42  ;;  %v1668_v60 = vadd.f32 %v1667_v52, %v1653_v50  ;;  %v1655_v5 = vmul.f32 %v1325_v54, %v1325_v54  ;;  %v1641_v6 = vsel %vm315_vm0, %v1611_v49, 0.0 }
  0xf5   : > { %v1572_v61 = vadd.f32 %v1571_v57, %v1570_v29  ;;  %v1640_v2 = vadd.f32 %v1639_v62, %v1638_v58  ;;  %v1656_v10 = vmul.f32 %v1327_v56, %v1327_v56  ;;  %v1398_v11 = vadd.f32 %v1397_v0, %v2029_v51 }
  0xf6   : > { %v1669_v3 = vadd.f32 %v1668_v60, %v1654_v55  ;;  %v1584_v4 = vadd.f32 %v1583_v59, %v1325_v54  ;;  %v1657_v13 = vmul.f32 %v1396_v63, %v1396_v63  ;;  %v1467_v16 = vadd.f32 %v1466_v1, %v2029_v51 }
  0xf7   : > { %1573 = vadd.xlane.f32.xlu1 %v1572_v61  ;;  %v1642_v7 = vadd.f32 %v1641_v6, %v1640_v2  ;;  %v1658_v19 = vmul.f32 %v1398_v11, %v1398_v11  ;;  %v1469_v21 = vadd.f32 %v1468_v12, %v2029_v51  ;;  %v1538_v25 = vadd.f32 %v1537_v17, %v2029_v51 }
  0xf8   : > { %v1670_v8 = vadd.f32 %v1669_v3, %v1655_v5  ;;  %v1585_v9 = vadd.f32 %v1584_v4, %v1327_v56  ;;  %v1659_v24 = vmul.f32 %v1467_v16, %v1467_v16  ;;  %v1540_v33 = vadd.f32 %v1539_v26, %v2029_v51 }
  0xf9   : > { %1643 = vadd.xlane.f32.xlu0 %v1642_v7  ;;  %v1660_v28 = vmul.f32 %v1469_v21, %v1469_v21  ;;  %v1661_v31 = vmul.f32 %v1538_v25, %v1538_v25 }
  0xfa   : > { %v1671_v14 = vadd.f32 %v1670_v8, %v1656_v10  ;;  %v1586_v15 = vadd.f32 %v1585_v9, %v1396_v63  ;;  %v1662_v37 = vmul.f32 %v1540_v33, %v1540_v33 }
  0xfc   : > { %v1587_v18 = vadd.f32 %v1586_v15, %v1398_v11  ;;  %v1672_v20 = vadd.f32 %v1671_v14, %v1657_v13 }
  0xfe   : > { %v1673_v22 = vadd.f32 %v1672_v20, %v1658_v19  ;;  %v1588_v23 = vadd.f32 %v1587_v18, %v1467_v16 }
 0x100   : > { %v1674_v27 = vadd.f32 %v1673_v22, %v1659_v24  ;;  %v1589_v30 = vadd.f32 %v1588_v23, %v1469_v21 }
 0x102   : > { %v1675_v32 = vadd.f32 %v1674_v27, %v1660_v28  ;;  %v1590_v34 = vadd.f32 %v1589_v30, %v1538_v25 }
 0x104   : > { %v1591_v35 = vadd.f32 %v1590_v34, %v1540_v33  ;;  %v1676_v36 = vadd.f32 %v1675_v32, %v1661_v31 }
 0x106   : > { %1592 = vadd.xlane.f32.xlu1 %v1591_v35  ;;  %v1677_v39 = vadd.f32 %v1676_v36, %v1662_v37 }
 0x10a   : > { %1678 = vadd.xlane.f32.xlu1 %v1677_v39 }
 0x180   : > { %v1574_v40 = vpop.xlane.xlu1 %1573 }
 0x181   : > { %1576 = vst.msk [vmem:[%s271_s17] sm:$0xf] %vm1575_vm2, %v1574_v40 }
 0x182   : > { %v1644_v41 = vpop.xlane.xlu0 %1643 }
 0x183   : > { %1807 = vst.msk [vmem:[%s271_s17 + $0x10] sm:$0xf] %vm1575_vm2, %v1644_v41 }
 0x18f   : > { %v1593_v42 = vpop.xlane.xlu1 %1592 }
 0x190   : > { %1595 = vst.msk [vmem:[%s271_s17 + $0x4] sm:$0xff] %vm1594_vm3, %v1593_v42 }
 0x193   : > { %v1679_v51 = vpop.xlane.xlu1 %1678 }
 0x194   : > { %1808 = vst.msk [vmem:[%s271_s17 + $0x14] sm:$0xff] %vm1594_vm3, %v1679_v51 }
 0x195 PF: > { %s16_s21 = sadd.s32 1, %s1847_s21  }
 0x196   : > { %p13_p4 = scmp.ge.s32.totalorder %s16_s21, 4  }
 0x198   :  { %15 = sbr.rel (!%p13_p4) target bundleno = 1 (0x1), region = 78 }

// kernel: self_attention_freq.3
= control target key start
LH: loop header
LB: loop body
LE: loop exit
PB: predicated region body
PF: predicated region fallthrough
CT: control target
= control target key end

     0   :  { %8 = vsyncpa [#allocation5], 0  ;;  %s2225_s0 = inlined_call_operand.vmem [shape: f32[2,4,16,128], index: 0, kind: input, shape index: {}]   ;;  %s2226_s1 = inlined_call_operand.vmem [shape: f32[2,4,16,128], index: 1, kind: input, shape index: {}]   ;;  %s2227_s2 = inlined_call_operand.vmem [shape: f32[12,5], index: 2, kind: input, shape index: {}]   ;;  %s2228_s3 = inlined_call_operand.hbm [shape: f32[2,4,16,128], index: 3, kind: output, shape index: {}]  }
   0x1   :  { %9 = vsyncpa [#allocation4], 0 }
   0x2   :  { %11 = vsyncpa [#allocation4 + $0x1], 0  ;;  %s1761_s12 = smov 0   ;;  %s1763_s13 = smov 0  }
   0x3   :  { %s1765_s14 = smov 0   ;;  %s1767_s15 = smov 0  }
   0x4 LB: > { %s1782_s16 = sadd.s32 4294967295, %s1733_s15   ;;  %s1420_s17 = sadd.s32 4294967294, %s1733_s15   ;;  %s1733_s15 = sphi %s1767_s15, %s2236_s15   ;;  %s1729_s14 = sphi %s1765_s14, %s2235_s14   ;;  %s1725_s13 = sphi %s1763_s13, %s2234_s13   ;;  %s1721_s12 = sphi %s1761_s12, %s2233_s12  }
   0x5   : > { %s1786_s18 = sadd.s32 1, %s1733_s15   ;;  %s97_s19 = sadd.s32 1, %s1729_s14 }
   0x6   : > { %s94_s20 = ssub.s32 %s1733_s15, %s1786_s18  ;;  %p107_p0 = scmp.ne.s32.totalorder %s1729_s14, %s1725_s13 }
   0x7   : > { %p95_p1 = scmp.eq.s32.totalorder %s94_s20, 0  ;;  %p108_p2 = scmp.eq.s32.totalorder %s1782_s16, 1 }
   0x8   : > { %p113_p3 = scmp.ne.s32.totalorder %s1725_s13, %s1721_s12  ;;  %p114_p4 = scmp.eq.s32.totalorder %s1420_s17, 1 }
   0x9   : > { %s1797_s21 = scalar_select %p95_p1, %s1729_s14, %s97_s19  }
   0xa   : > { %p1799_p5 = por %p108_p2, %p107_p0  ;;  %p1803_p6 = por %p114_p4, %p113_p3 }
   0xb   : > { %p1421_p7 = scmp.ge.s32.totalorder %s1733_s15, 1  ;;  %p121_p8 = scmp.lt.s32.totalorder %s1733_s15, 3 }
   0xc   : > { %p1608_p9 = scmp.eq.s32.totalorder %s1782_s16, 0  ;;  %s133_s27 = sshll.u32 %s2227_s2, 4  ;;  %s134_s27 = int_to_ptr.vmem [resolvable:$true] %s133_s27 }
   0xd   : > { %p1810_p10 = pnand %p1421_p7, %p121_p8  ;;  %s1654_s29 = scalar_lea.vmem %s134_s27, 256 }
   0xe   : > { %p1655_p13 = scmp.ne.s32.totalorder %s134_s27, %s1654_s29  ;;  %p1662_p3 = scmp.lt.s32.totalorder %s134_s27, %s134_s27 }
   0xf   : > { %p1600_p11 = pneg %p1810_p10  ;;  %p1663_p4 = scmp.lt.s32.totalorder %s1654_s29, %s1654_s29 }
  0x11   : > { %p1821_p12 = pnand %p1608_p9, %p1600_p11  ;;  %p1664_p7 = por %p1663_p4, %p1662_p3 }
  0x13   : > { %p1656_p0 = pneg %p1821_p12 }
  0x15   : > { %p1657_p1 = pnand %p1656_p0, %p1655_p13 }
  0x17   : > { %p1658_p2 = pneg %p1657_p1 }
  0x19   : > { %p1665_p8 = pnand %p1664_p7, %p1658_p2 }
  0x1b   : > { %1668 = shalt.err (!%p1665_p8)
}
  0x1c   : > { %s1735_s30 = smov [#allocation3]   ;;  %s1736_s4 = smov 128  }
  0x1d   : > { %s1737_s5 = smov 8   ;;  %165 = sbr.rel (%p1810_p10) target bundleno = 586 (0x24a), region = 32 }
  0x1e   : > { %1603 = dma.vmem_to_smem (!%p1821_p12), %s134_s27, 256, %s1735_s30, [#allocation5], %s1736_s4, %s1736_s4, %s1737_s5  }
  0x22   : > { %1712 = dma.done.wait (%p1608_p9), [#allocation5], 256  }
  0x23   : > { %1714 = vsyncadd (%p1608_p9), [#allocation5], 4294967040 }
  0x24   : > { %171 = sfence }
  0x25   : > { %p195_p11 = scmp.lt.s32.totalorder %s1782_s16, 1  ;;  %s1450_s6 = sld [smem:[#allocation3 + $0x204]] }
  0x26   : > { %s1451_s7 = sld [smem:[#allocation3 + $0x200]] }
  0x27   : > { %s1837_s8 = scalar_select %p195_p11, %s1782_s16, 1 }
  0x28   : > { %s1452_s9 = sld [smem:[#allocation3 + $0x201]] }
  0x29   : > { %s1503_s10 = sshll.u32 %s1837_s8, 6  ;;  %s1453_s11 = sld [smem:[#allocation3 + $0x202]] }
  0x2a   : > { %s204_s20 = scalar_lea.vmem %s2226_s1, %s1503_s10  ;;  %s1845_s24 = sld [smem:[#allocation3 + $0x203]] }
  0x2b   : > { %v1847_v0 = vld [vmem:[%s204_s20 + $0x8] sm:$0xff]  ;;  %s1849_s25 = sld [smem:[#allocation3 + $0x284]]  ;;  %v1851_v1 = vld [vmem:[%s204_s20 + $0x18] sm:$0xff]  ;;  %v365_v3 = vstv %s1450_s6  ;;  %v1855_v4 = vld [vmem:[%s204_s20] sm:$0xff] }
  0x2c   : > { %v362_v2 = vstv %s1451_s7  ;;  %s1853_s26 = sld [smem:[#allocation3 + $0x280]]  ;;  %v1857_v5 = vld [vmem:[%s204_s20 + $0x28] sm:$0xff]  ;;  %v1862_v7 = vld [vmem:[%s204_s20 + $0x10] sm:$0xff]  ;;  %v1864_v8 = vld [vmem:[%s204_s20 + $0x20] sm:$0xff] }
  0x2d   : > { %v364_v6 = vmul.f32 %v362_v2, %v1847_v0  ;;  %s1860_s27 = sld [smem:[#allocation3 + $0x281]]  ;;  %v363_v9 = vmul.f32 %v362_v2, %v1855_v4  ;;  %v1867_v10 = vld [vmem:[%s204_s20 + $0x38] sm:$0xff]  ;;  %v1874_v15 = vld [vmem:[%s204_s20 + $0x30] sm:$0xff] }
  0x2e   : > { %v369_v11 = vstv %s1452_s9  ;;  %s1869_s28 = sld [smem:[#allocation3 + $0x282]]  ;;  %s1898_s9 = scalar_lea.vmem %s2225_s0, %s1503_s10 }
  0x2f   : > { %v367_v12 = vadd.f32 %v365_v3, %v364_v6  ;;  %v371_v13 = vmul.f32 %v369_v11, %v1851_v1  ;;  %v375_v14 = vstv %s1453_s11  ;;  %s1872_s29 = sld [smem:[#allocation3 + $0x283]]  ;;  %v366_v16 = vadd.f32 %v365_v3, %v363_v9  ;;  %v1914_v43 = vld [vmem:[%s1898_s9] sm:$0xff]  ;;  %v1920_v47 = vld [vmem:[%s1898_s9 + $0x10] sm:$0xff] }
  0x30   : > { %v377_v17 = vmul.f32 %v375_v14, %v1857_v5  ;;  %v381_v18 = vstv %s1845_s24  ;;  %v370_v19 = vmul.f32 %v369_v11, %v1862_v7  ;;  %v376_v20 = vmul.f32 %v375_v14, %v1864_v8  ;;  %s1880_s30 = sld [smem:[#allocation3 + $0x4]]  ;;  %v1925_v50 = vld [vmem:[%s1898_s9 + $0x20] sm:$0xff]  ;;  %v1935_v58 = vld [vmem:[%s1898_s9 + $0x30] sm:$0xff] }
  0x31   : > { %v373_v21 = vadd.f32 %v371_v13, %v367_v12  ;;  %v383_v22 = vmul.f32 %v381_v18, %v1867_v10  ;;  %s1883_s4 = sld [smem:[#allocation3]]  ;;  %v400_v24 = vstv %s1849_s25  ;;  %v382_v26 = vmul.f32 %v381_v18, %v1874_v15 }
  0x32   : > { %v397_v23 = vstv %s1853_s26  ;;  %v372_v25 = vadd.f32 %v370_v19, %v366_v16  ;;  %s1888_s5 = sld [smem:[#allocation3 + $0x1]]  ;;  %v1950_v16 = vld [vmem:[%s1898_s9 + $0x8] sm:$0xff] }
  0x33   : > { %v379_v27 = vadd.f32 %v377_v17, %v373_v21  ;;  %v399_v28 = vmul.f32 %v397_v23, %v1847_v0  ;;  %v404_v29 = vstv %s1860_s27  ;;  %v398_v30 = vmul.f32 %v397_v23, %v1855_v4  ;;  %s1900_s11 = sld [smem:[#allocation3 + $0x2]] }
  0x34   : > { %v406_v31 = vmul.f32 %v404_v29, %v1851_v1  ;;  %v410_v32 = vstv %s1869_s28  ;;  %v378_v33 = vadd.f32 %v376_v20, %v372_v25  ;;  %v405_v34 = vmul.f32 %v404_v29, %v1862_v7  ;;  %s1905_s17 = sld [smem:[#allocation3 + $0x3]]  ;;  %v1957_v20 = vld [vmem:[%s1898_s9 + $0x18] sm:$0xff]  ;;  %v1964_v25 = vld [vmem:[%s1898_s9 + $0x28] sm:$0xff] }
  0x35   : > { %v385_v35 = vadd.f32 %v383_v22, %v379_v27  ;;  %v402_v36 = vadd.f32 %v400_v24, %v399_v28  ;;  %v412_v37 = vmul.f32 %v410_v32, %v1857_v5  ;;  %v416_v38 = vstv %s1872_s29  ;;  %s1909_s8 = sld [smem:[#allocation3 + $0x84]] }
  0x36   : > { %v418_v39 = vmul.f32 %v416_v38, %v1867_v10  ;;  %v384_v40 = vadd.f32 %v382_v26, %v378_v33  ;;  %v401_v41 = vadd.f32 %v400_v24, %v398_v30  ;;  %v411_v42 = vmul.f32 %v410_v32, %v1864_v8  ;;  %s1916_s10 = sld [smem:[#allocation3 + $0x80]]  ;;  %v1967_v26 = vld [vmem:[%s1898_s9 + $0x38] sm:$0xff] }
  0x37   : > { %vm387_vm0 = vcmp.ge.f32.partialorder %v385_v35, 0.0  ;;  %v389_v44 = vmul.f32 0.01, %v385_v35  ;;  %v408_v45 = vadd.f32 %v406_v31, %v402_v36  ;;  %v417_v46 = vmul.f32 %v416_v38, %v1874_v15  ;;  %s1922_s19 = sld [smem:[#allocation3 + $0x81]] }
  0x38   : > { %vm386_vm1 = vcmp.ge.f32.partialorder %v384_v40, 0.0  ;;  %v388_v48 = vmul.f32 0.01, %v384_v40  ;;  %v407_v49 = vadd.f32 %v405_v34, %v401_v41  ;;  %v223_v51 = vstv %s1883_s4  ;;  %s1928_s20 = sld [smem:[#allocation3 + $0x82]] }
  0x39   : > { %v391_v52 = vsel %vm387_vm0, %v385_v35, %v389_v44  ;;  %v414_v53 = vadd.f32 %v412_v37, %v408_v45  ;;  %v224_v54 = vmul.f32 %v223_v51, %v1914_v43  ;;  %v226_v55 = vstv %s1880_s30  ;;  %s1932_s24 = sld [smem:[#allocation3 + $0x83]] }
  0x3a   : > { %1538 = vmatprep.subr.mxu0 %v391_v52  ;;  %v390_v56 = vsel %vm386_vm1, %v384_v40, %v388_v48  ;;  %v413_v57 = vadd.f32 %v411_v42, %v407_v49  ;;  %v230_v59 = vstv %s1888_s5  ;;  %v236_v60 = vstv %s1900_s11  ;;  %s1941_s25 = sld [smem:[#allocation3 + $0x304]] }
  0x3b   : > { %v420_v61 = vadd.f32 %v418_v39, %v414_v53  ;;  %1539 = vmatpush3.xpose.msra.mxu0 %v391_v52  ;;  %v227_v62 = vadd.f32 %v226_v55, %v224_v54  ;;  %v231_v63 = vmul.f32 %v230_v59, %v1920_v47  ;;  %v237_v2 = vmul.f32 %v236_v60, %v1925_v50  ;;  %s1946_s26 = sld [smem:[#allocation3 + $0x300]] }
  0x3c   : > { %1540 = vmatprep.subr.mxu0 %v390_v56  ;;  %v419_v3 = vadd.f32 %v417_v46, %v413_v57  ;;  %v242_v6 = vstv %s1905_s17  ;;  %v257_v9 = vstv %s1916_s10  ;;  %v260_v11 = vstv %s1909_s8  ;;  %s1952_s27 = sld [smem:[#allocation3 + $0x301]] }
  0x3d   : > { %vm422_vm2 = vcmp.ge.f32.partialorder %v420_v61, 0.0  ;;  %v424_v12 = vmul.f32 0.01, %v420_v61  ;;  %v233_v13 = vadd.f32 %v231_v63, %v227_v62  ;;  %v243_v14 = vmul.f32 %v242_v6, %v1935_v58  ;;  %s1959_s28 = sld [smem:[#allocation3 + $0x302]] }
  0x3e   : > { %vm421_vm3 = vcmp.ge.f32.partialorder %v419_v3, 0.0  ;;  %v423_v17 = vmul.f32 0.01, %v419_v3  ;;  %v258_v18 = vmul.f32 %v257_v9, %v1914_v43  ;;  %v264_v19 = vstv %s1922_s19  ;;  %s1969_s29 = sld [smem:[#allocation3 + $0x303]] }
  0x3f   : > { %v426_v21 = vsel %vm422_vm2, %v420_v61, %v424_v12  ;;  %1541 = vmatpush3.xpose.msra.mxu0 %v390_v56  ;;  %v239_v22 = vadd.f32 %v237_v2, %v233_v13  ;;  %v265_v23 = vmul.f32 %v264_v19, %v1920_v47  ;;  %v270_v24 = vstv %s1928_s20  ;;  %s1976_s30 = sld [smem:[#allocation3 + $0x380]] }
  0x40   : > { %1545 = vmatprep.subr.mxu1 %v426_v21  ;;  %v425_v27 = vsel %vm421_vm3, %v419_v3, %v423_v17  ;;  %v261_v28 = vadd.f32 %v260_v11, %v258_v18  ;;  %v271_v29 = vmul.f32 %v270_v24, %v1925_v50  ;;  %v276_v30 = vstv %s1932_s24  ;;  %s1981_s4 = sld [smem:[#allocation3 + $0x384]] }
  0x41   : > { %1546 = vmatpush3.xpose.msra.mxu1 %v426_v21  ;;  %v245_v31 = vadd.f32 %v243_v14, %v239_v22  ;;  %v277_v32 = vmul.f32 %v276_v30, %v1935_v58  ;;  %v225_v33 = vmul.f32 %v223_v51, %v1950_v16  ;;  %v232_v34 = vmul.f32 %v230_v59, %v1957_v20  ;;  %s1984_s5 = sld [smem:[#allocation3 + $0x381]] }
  0x42   : > { %1547 = vmatprep.subr.mxu1 %v425_v27  ;;  %v267_v35 = vadd.f32 %v265_v23, %v261_v28  ;;  %v238_v36 = vmul.f32 %v236_v60, %v1964_v25  ;;  %v244_v37 = vmul.f32 %v242_v6, %v1967_v26  ;;  %v259_v38 = vmul.f32 %v257_v9, %v1950_v16  ;;  %s1988_s6 = sld [smem:[#allocation3 + $0x382]] }
  0x43   : > { %vm247_vm4 = vcmp.ge.f32.partialorder %v245_v31, 0.0  ;;  %v249_v39 = vmul.f32 0.01, %v245_v31  ;;  %v228_v40 = vadd.f32 %v226_v55, %v225_v33  ;;  %v266_v41 = vmul.f32 %v264_v19, %v1957_v20  ;;  %s1992_s7 = sld [smem:[#allocation3 + $0x383]] }
  0x44   : > { %v273_v42 = vadd.f32 %v271_v29, %v267_v35  ;;  %v262_v44 = vadd.f32 %v260_v11, %v259_v38  ;;  %v272_v45 = vmul.f32 %v270_v24, %v1964_v25  ;;  %v278_v46 = vmul.f32 %v276_v30, %v1967_v26  ;;  %s1999_s9 = sld [smem:[#allocation3 + $0x104]] }
  0x45   : > { %1548 = vmatpush3.xpose.msra.mxu1 %v425_v27  ;;  %v251_v48 = vsel %vm247_vm4, %v245_v31, %v249_v39  ;;  %v234_v49 = vadd.f32 %v232_v34, %v228_v40  ;;  %v432_v51 = vstv %s1946_s26  ;;  %v435_v52 = vstv %s1941_s25  ;;  %s2004_s11 = sld [smem:[#allocation3 + $0x100]] }
  0x46   : > { %1542 = vmatprep.mubr.f32.mxu0 %v251_v48  ;;  %v279_v53 = vadd.f32 %v277_v32, %v273_v42  ;;  %v268_v54 = vadd.f32 %v266_v41, %v262_v44  ;;  %v434_v55 = vmul.f32 %v432_v51, %v1847_v0  ;;  %v439_v56 = vstv %s1952_s27  ;;  %s2007_s17 = sld [smem:[#allocation3 + $0x101]] }
  0x47   : > { %v240_v57 = vadd.f32 %v238_v36, %v234_v49  ;;  %v441_v59 = vmul.f32 %v439_v56, %v1851_v1  ;;  %v445_v60 = vstv %s1959_s28  ;;  %v451_v61 = vstv %s1969_s29  ;;  %s2011_s8 = sld [smem:[#allocation3 + $0x102]] }
  0x48   : > { %vm281_vm5 = vcmp.ge.f32.partialorder %v279_v53, 0.0  ;;  %v283_v62 = vmul.f32 0.01, %v279_v53  ;;  %v274_v63 = vadd.f32 %v272_v45, %v268_v54  ;;  %v437_v2 = vadd.f32 %v435_v52, %v434_v55  ;;  %s2013_s10 = sld [smem:[#allocation3 + $0x103]] }
  0x49   : > { %v246_v3 = vadd.f32 %v244_v37, %v240_v57  ;;  %v447_v6 = vmul.f32 %v445_v60, %v1857_v5  ;;  %v453_v9 = vmul.f32 %v451_v61, %v1867_v10  ;;  %v467_v11 = vstv %s1976_s30  ;;  %s2020_s19 = sld [smem:[#allocation3 + $0x184]] }
  0x4a   : > { %v285_v12 = vsel %vm281_vm5, %v279_v53, %v283_v62  ;;  %v280_v13 = vadd.f32 %v278_v46, %v274_v63  ;;  %v443_v14 = vadd.f32 %v441_v59, %v437_v2  ;;  %v469_v17 = vmul.f32 %v467_v11, %v1847_v0  ;;  %s2025_s20 = sld [smem:[#allocation3 + $0x180]] }
  0x4b   : > { %1549 = vmatprep.mubr.f32.mxu1 %v285_v12  ;;  %vm248_vm6 = vcmp.ge.f32.partialorder %v246_v3, 0.0  ;;  %v250_v18 = vmul.f32 0.01, %v246_v3  ;;  %v470_v19 = vstv %s1981_s4  ;;  %v474_v21 = vstv %s1984_s5  ;;  %s2029_s24 = sld [smem:[#allocation3 + $0x181]] }
  0x4c   : > { %vm282_vm7 = vcmp.ge.f32.partialorder %v280_v13, 0.0  ;;  %v284_v22 = vmul.f32 0.01, %v280_v13  ;;  %v449_v23 = vadd.f32 %v447_v6, %v443_v14  ;;  %v472_v24 = vadd.f32 %v470_v19, %v469_v17  ;;  %s2033_s25 = sld [smem:[#allocation3 + $0x182]] }
  0x4d   : > { %v252_v27 = vsel %vm248_vm6, %v246_v3, %v250_v18  ;;  %v476_v28 = vmul.f32 %v474_v21, %v1851_v1  ;;  %v480_v29 = vstv %s1988_s6  ;;  %v486_v30 = vstv %s1992_s7  ;;  %s2039_s26 = sld [smem:[#allocation3 + $0x183]] }
  0x4e   : > { %1543 = vmatmul.mubr.f32.vlgmr.msra.gmra.mxu0 %v252_v27  ;;  %v286_v31 = vsel %vm282_vm7, %v280_v13, %v284_v22  ;;  %v455_v32 = vadd.f32 %v453_v9, %v449_v23  ;;  %v482_v33 = vmul.f32 %v480_v29, %v1857_v5  ;;  %v488_v34 = vmul.f32 %v486_v30, %v1867_v10  ;;  %s1470_s27 = sld [smem:[#allocation3 + $0x404]] }
  0x4f   : > { %1550 = vmatmul.mubr.f32.vlgmr.msra.gmra.mxu1 %v286_v31  ;;  %v478_v35 = vadd.f32 %v476_v28, %v472_v24  ;;  %v433_v36 = vmul.f32 %v432_v51, %v1855_v4  ;;  %v440_v37 = vmul.f32 %v439_v56, %v1862_v7  ;;  %v446_v38 = vmul.f32 %v445_v60, %v1864_v8  ;;  %s1471_s28 = sld [smem:[#allocation3 + $0x400]] }
  0x50   : > { %vm457_vm8 = vcmp.ge.f32.partialorder %v455_v32, 0.0  ;;  %v459_v39 = vmul.f32 0.01, %v455_v32  ;;  %v452_v40 = vmul.f32 %v451_v61, %v1874_v15  ;;  %v468_v41 = vmul.f32 %v467_v11, %v1855_v4  ;;  %s1472_s29 = sld [smem:[#allocation3 + $0x401]] }
  0x51   : > { %v484_v42 = vadd.f32 %v482_v33, %v478_v35  ;;  %v436_v44 = vadd.f32 %v435_v52, %v433_v36  ;;  %v475_v45 = vmul.f32 %v474_v21, %v1862_v7  ;;  %v481_v46 = vmul.f32 %v480_v29, %v1864_v8  ;;  %s1473_s30 = sld [smem:[#allocation3 + $0x402]] }
  0x52   : > { %v461_v48 = vsel %vm457_vm8, %v455_v32, %v459_v39  ;;  %v471_v49 = vadd.f32 %v470_v19, %v468_v41  ;;  %v487_v51 = vmul.f32 %v486_v30, %v1874_v15  ;;  %v292_v53 = vstv %s2004_s11  ;;  %s1474_s4 = sld [smem:[#allocation3 + $0x403]] }
  0x53   : > { %1552 = vmatprep.subr.mxu0 %v461_v48  ;;  %v490_v54 = vadd.f32 %v488_v34, %v484_v42  ;;  %v442_v55 = vadd.f32 %v440_v37, %v436_v44  ;;  %v293_v56 = vmul.f32 %v292_v53, %v1914_v43  ;;  %v295_v52 = vstv %s1999_s9  ;;  %s2064_s5 = sld [smem:[#allocation3 + $0x484]] }
  0x54   : > { %1553 = vmatpush3.xpose.msra.mxu0 %v461_v48  ;;  %v477_v57 = vadd.f32 %v475_v45, %v471_v49  ;;  %v299_v59 = vstv %s2007_s17  ;;  %v305_v60 = vstv %s2011_s8  ;;  %v311_v61 = vstv %s2013_s10  ;;  %s1476_s6 = sld [smem:[#allocation3 + $0x480]] }
  0x55   : > { %vm492_vm9 = vcmp.ge.f32.partialorder %v490_v54, 0.0  ;;  %v494_v62 = vmul.f32 0.01, %v490_v54  ;;  %v448_v63 = vadd.f32 %v446_v38, %v442_v55  ;;  %v296_v2 = vadd.f32 %v295_v52, %v293_v56  ;;  %s2066_s7 = sld [smem:[#allocation3 + $0x481]] }
  0x56   : > { %v483_v3 = vadd.f32 %v481_v46, %v477_v57  ;;  %v300_v6 = vmul.f32 %v299_v59, %v1920_v47  ;;  %v306_v9 = vmul.f32 %v305_v60, %v1925_v50  ;;  %v312_v11 = vmul.f32 %v311_v61, %v1935_v58  ;;  %s2069_s9 = sld [smem:[#allocation3 + $0x482]] }
  0x57   : > { %v496_v12 = vsel %vm492_vm9, %v490_v54, %v494_v62  ;;  %v454_v13 = vadd.f32 %v452_v40, %v448_v63  ;;  %v327_v14 = vstv %s2025_s20  ;;  %v330_v17 = vstv %s2020_s19  ;;  %s2073_s11 = sld [smem:[#allocation3 + $0x483]] }
  0x58   : > { %1559 = vmatprep.subr.mxu1 %v496_v12  ;;  %v489_v18 = vadd.f32 %v487_v51, %v483_v3  ;;  %v302_v19 = vadd.f32 %v300_v6, %v296_v2  ;;  %v328_v21 = vmul.f32 %v327_v14, %v1914_v43  ;;  %v334_v22 = vstv %s2029_s24  ;;  %s2077_s17 = sld [smem:[#allocation3 + $0x504]] }
  0x59   : > { %1560 = vmatpush3.xpose.msra.mxu1 %v496_v12  ;;  %vm456_vm10 = vcmp.ge.f32.partialorder %v454_v13, 0.0  ;;  %v458_v23 = vmul.f32 0.01, %v454_v13  ;;  %v335_v24 = vmul.f32 %v334_v22, %v1920_v47  ;;  %v340_v27 = vstv %s2033_s25  ;;  %s2082_s8 = sld [smem:[#allocation3 + $0x500]] }
  0x5a   : > { %vm491_vm11 = vcmp.ge.f32.partialorder %v489_v18, 0.0  ;;  %v493_v28 = vmul.f32 0.01, %v489_v18  ;;  %v308_v29 = vadd.f32 %v306_v9, %v302_v19  ;;  %v331_v30 = vadd.f32 %v330_v17, %v328_v21  ;;  %s2085_s10 = sld [smem:[#allocation3 + $0x501]] }
  0x5b   : > { %v460_v31 = vsel %vm456_vm10, %v454_v13, %v458_v23  ;;  %v341_v32 = vmul.f32 %v340_v27, %v1925_v50  ;;  %v346_v33 = vstv %s2039_s26  ;;  %v294_v34 = vmul.f32 %v292_v53, %v1950_v16  ;;  %s2090_s19 = sld [smem:[#allocation3 + $0x502]] }
  0x5c   : > { %1554 = vmatprep.subr.mxu0 %v460_v31  ;;  %v495_v35 = vsel %vm491_vm11, %v489_v18, %v493_v28  ;;  %v314_v43 = vadd.f32 %v312_v11, %v308_v29  ;;  %v337_v36 = vadd.f32 %v335_v24, %v331_v30  ;;  %v347_v37 = vmul.f32 %v346_v33, %v1935_v58  ;;  %s2094_s20 = sld [smem:[#allocation3 + $0x503]] }
  0x5d   : > { %1561 = vmatprep.subr.mxu1 %v495_v35  ;;  %1555 = vmatpush3.xpose.msra.mxu0 %v460_v31  ;;  %v297_v47 = vadd.f32 %v295_v52, %v294_v34  ;;  %v301_v38 = vmul.f32 %v299_v59, %v1957_v20  ;;  %v307_v39 = vmul.f32 %v305_v60, %v1964_v25  ;;  %v509_v63 = vstv %s1472_s29  ;;  %s2098_s24 = sld [smem:[#allocation3 + $0x584]]  ;;  %s192_s29 = sand.u32 1, %s1725_s13  }
  0x5e   : > { %1562 = vmatpush3.xpose.msra.mxu1 %v495_v35  ;;  %vm316_vm12 = vcmp.ge.f32.partialorder %v314_v43, 0.0  ;;  %v318_v40 = vmul.f32 0.01, %v314_v43  ;;  %v343_v50 = vadd.f32 %v341_v32, %v337_v36  ;;  %v313_v42 = vmul.f32 %v311_v61, %v1967_v26  ;;  %s2102_s25 = sld [smem:[#allocation3 + $0x580]] }
  0x5f   : > { %v303_v41 = vadd.f32 %v301_v38, %v297_v47  ;;  %v329_v44 = vmul.f32 %v327_v14, %v1950_v16  ;;  %v336_v45 = vmul.f32 %v334_v22, %v1957_v20  ;;  %v342_v51 = vmul.f32 %v340_v27, %v1964_v25  ;;  %s2107_s26 = sld [smem:[#allocation3 + $0x581]] }
  0x60   : > { %v320_v46 = vsel %vm316_vm12, %v314_v43, %v318_v40  ;;  %v349_v58 = vadd.f32 %v347_v37, %v343_v50  ;;  %v348_v56 = vmul.f32 %v346_v33, %v1967_v26  ;;  %v502_v25 = vstv %s1471_s28  ;;  %s2115_s28 = sld [smem:[#allocation3 + $0x583]] }
  0x61   : > { %1556 = vmatprep.mubr.f32.mxu0 %v320_v46  ;;  %v309_v48 = vadd.f32 %v307_v39, %v303_v41  ;;  %v332_v49 = vadd.f32 %v330_v17, %v329_v44  ;;  %v505_v26 = vstv %s1470_s27  ;;  %v504_v62 = vmul.f32 %v502_v25, %v1847_v0  ;;  %s2111_s27 = sld [smem:[#allocation3 + $0x582]] }
  0x62   : > { %vm351_vm13 = vcmp.ge.f32.partialorder %v349_v58, 0.0  ;;  %v353_v53 = vmul.f32 0.01, %v349_v58  ;;  %v503_v2 = vmul.f32 %v502_v25, %v1855_v4  ;;  %v511_v3 = vmul.f32 %v509_v63, %v1851_v1 }
  0x63   : > { %v315_v54 = vadd.f32 %v313_v42, %v309_v48  ;;  %v338_v55 = vadd.f32 %v336_v45, %v332_v49  ;;  %v515_v6 = vstv %s1473_s30  ;;  %v510_v9 = vmul.f32 %v509_v63, %v1862_v7  ;;  %s1426_s30 = sshll.u32 %s192_s29, 6 }
  0x64   : > { %v355_v52 = vsel %vm351_vm13, %v349_v58, %v353_v53  ;;  %v507_v11 = vadd.f32 %v505_v26, %v504_v62  ;;  %v517_v12 = vmul.f32 %v515_v6, %v1857_v5  ;;  %v521_v13 = vstv %s1474_s4  ;;  %s194_s4 = scalar_lea.vmem [#allocation6], %s1426_s30 }
  0x65   : > { %1563 = vmatprep.mubr.f32.mxu1 %v355_v52  ;;  %vm317_vm14 = vcmp.ge.f32.partialorder %v315_v54, 0.0  ;;  %v319_v57 = vmul.f32 0.01, %v315_v54  ;;  %v344_v16 = vadd.f32 %v342_v51, %v338_v55  ;;  %v506_v14 = vadd.f32 %v505_v26, %v503_v2 }
  0x66   : > { %v523_v17 = vmul.f32 %v521_v13, %v1867_v10  ;;  %v540_v18 = vstv %s2064_s5  ;;  %v516_v19 = vmul.f32 %v515_v6, %v1864_v8  ;;  %v513_v21 = vadd.f32 %v511_v3, %v507_v11  ;;  %s1334_s5 = sshll.u32 %s194_s4, 4  ;;  %s2178_s5 = int_to_ptr.vmem [resolvable:$true] %s1334_s5 }
  0x67   : > { %v321_v59 = vsel %vm317_vm14, %v315_v54, %v319_v57  ;;  %v350_v20 = vadd.f32 %v348_v56, %v344_v16  ;;  %v537_v22 = vstv %s1476_s6  ;;  %v512_v23 = vadd.f32 %v510_v9, %v506_v14  ;;  %s1505_s6 = sshll.u32 %s1782_s16, 10  ;;  %s1669_s16 = scalar_lea.vmem %s2178_s5, 1024 }
  0x68   : > { %1557 = vmatmul.mubr.f32.vlgmr.msra.gmra.mxu0 %v321_v59  ;;  %v522_v24 = vmul.f32 %v521_v13, %v1874_v15  ;;  %v539_v27 = vmul.f32 %v537_v22, %v1847_v0  ;;  %v544_v28 = vstv %s2066_s7  ;;  %v538_v29 = vmul.f32 %v537_v22, %v1855_v4  ;;  %p1670_p9 = scmp.ne.s32.totalorder %s2178_s5, %s1669_s16 }
  0x69   : > { %vm352_vm15 = vcmp.ge.f32.partialorder %v350_v20, 0.0  ;;  %v354_v60 = vmul.f32 0.01, %v350_v20  ;;  %v519_v30 = vadd.f32 %v517_v12, %v513_v21  ;;  %v546_v31 = vmul.f32 %v544_v28, %v1851_v1 }
  0x6a   : > { %v550_v32 = vstv %s2069_s9  ;;  %v518_v33 = vadd.f32 %v516_v19, %v512_v23  ;;  %v542_v34 = vadd.f32 %v540_v18, %v539_v27  ;;  %v556_v43 = vstv %s2073_s11  ;;  %s2183_s11 = scalar_lea.hbm %s2228_s3, %s1505_s6  ;;  %p1671_p10 = pnand %p1670_p9, %p1799_p5 }
  0x6b   : > { %v356_v61 = vsel %vm352_vm15, %v350_v20, %v354_v60  ;;  %v552_v35 = vmul.f32 %v550_v32, %v1857_v5  ;;  %v541_v36 = vadd.f32 %v540_v18, %v538_v29  ;;  %v525_v37 = vadd.f32 %v523_v17, %v519_v30 }
  0x6c   : > { %1564 = vmatmul.mubr.f32.vlgmr.msra.gmra.mxu1 %v356_v61  ;;  %v558_v47 = vmul.f32 %v556_v43, %v1867_v10  ;;  %v524_v38 = vadd.f32 %v522_v24, %v518_v33  ;;  %v545_v39 = vmul.f32 %v544_v28, %v1862_v7  ;;  %v548_v40 = vadd.f32 %v546_v31, %v542_v34  ;;  %p1672_p12 = pneg %p1671_p10 }
  0x6d   : > { %v551_v50 = vmul.f32 %v550_v32, %v1864_v8  ;;  %v557_v41 = vmul.f32 %v556_v43, %v1874_v15  ;;  %v572_v42 = vstv %s2082_s8  ;;  %vm527_vm0 = vcmp.ge.f32.partialorder %v525_v37, 0.0  ;;  %s1738_s8 = smov [#allocation6]  }
  0x6e   : > { %v529_v44 = vmul.f32 0.01, %v525_v37  ;;  %vm526_vm1 = vcmp.ge.f32.partialorder %v524_v38, 0.0  ;;  %v528_v45 = vmul.f32 0.01, %v524_v38  ;;  %v554_v46 = vadd.f32 %v552_v35, %v548_v40 }
  0x6f   : > { %v547_v58 = vadd.f32 %v545_v39, %v541_v36  ;;  %v574_v48 = vmul.f32 %v572_v42, %v1847_v0  ;;  %v575_v49 = vstv %s2077_s17  ;;  %v579_v54 = vstv %s2085_s10  ;;  %s2185_s17 = scalar_lea.sflag [#allocation4], %s192_s29  ;;  %s1673_s10 = sshll.u32 %s1738_s8, 4  ;;  %s1674_s10 = int_to_ptr.vmem [resolvable:$false] %s1673_s10 }
  0x70   : > { %v531_v51 = vsel %vm527_vm0, %v525_v37, %v529_v44  ;;  %v530_v53 = vsel %vm526_vm1, %v524_v38, %v528_v45  ;;  %v585_v55 = vstv %s2090_s19  ;;  %v560_v56 = vadd.f32 %v558_v47, %v554_v46  ;;  %s1675_s19 = scalar_lea.vmem %s1674_s10, 2048  ;;  %p1676_p13 = scmp.lt.s32.totalorder %s2178_s5, %s1674_s10 }
  0x71   : > { %1566 = vmatprep.subr.mxu0 %v531_v51  ;;  %v553_v52 = vadd.f32 %v551_v50, %v547_v58  ;;  %v577_v57 = vadd.f32 %v575_v49, %v574_v48  ;;  %v581_v16 = vmul.f32 %v579_v54, %v1851_v1  ;;  %v587_v59 = vmul.f32 %v585_v55, %v1857_v5  ;;  %p1677_p0 = scmp.lt.s32.totalorder %s1675_s19, %s1669_s16 }
  0x72   : > { %1567 = vmatpush3.msra.mxu0 %v531_v51  ;;  %v591_v20 = vstv %s2094_s20  ;;  %v607_v60 = vstv %s2102_s25  ;;  %v610_v61 = vstv %s2098_s24  ;;  %vm562_vm2 = vcmp.ge.f32.partialorder %v560_v56, 0.0 }
  0x73   : > { %v564_v25 = vmul.f32 0.01, %v560_v56  ;;  %1568 = vmatprep.subr.mxu0 %v530_v53  ;;  %v559_v26 = vadd.f32 %v557_v41, %v553_v52  ;;  %v583_v62 = vadd.f32 %v581_v16, %v577_v57  ;;  %v593_v63 = vmul.f32 %v591_v20, %v1867_v10  ;;  %p1678_p1 = por %p1677_p0, %p1676_p13 }
  0x74   : > { %1569 = vmatpush3.msra.mxu0 %v530_v53  ;;  %v609_v2 = vmul.f32 %v607_v60, %v1847_v0  ;;  %v614_v3 = vstv %s2107_s26  ;;  %v573_v6 = vmul.f32 %v572_v42, %v1855_v4  ;;  %v620_v17 = vstv %s2111_s27 }
  0x75   : > { %v566_v9 = vsel %vm562_vm2, %v560_v56, %v564_v25  ;;  %vm561_vm3 = vcmp.ge.f32.partialorder %v559_v26, 0.0  ;;  %v563_v11 = vmul.f32 0.01, %v559_v26  ;;  %v589_v12 = vadd.f32 %v587_v59, %v583_v62  ;;  %p1679_p2 = pnand %p1678_p1, %p1672_p12 }
  0x76   : > { %1573 = vmatprep.subr.mxu1 %v566_v9  ;;  %v612_v13 = vadd.f32 %v610_v61, %v609_v2  ;;  %v616_v14 = vmul.f32 %v614_v3, %v1851_v1  ;;  %v626_v18 = vstv %s2115_s28  ;;  %v622_v22 = vmul.f32 %v620_v17, %v1857_v5 }
  0x77   : > { %1574 = vmatpush3.msra.mxu1 %v566_v9  ;;  %v565_v19 = vsel %vm561_vm3, %v559_v26, %v563_v11  ;;  %v595_v21 = vadd.f32 %v593_v63, %v589_v12  ;;  %v628_v0 = vmul.f32 %v626_v18, %v1867_v10  ;;  %v576_v24 = vadd.f32 %v575_v49, %v573_v6 }
  0x78   : > { %1575 = vmatprep.subr.mxu1 %v565_v19  ;;  %v618_v23 = vadd.f32 %v616_v14, %v612_v13  ;;  %v580_v27 = vmul.f32 %v579_v54, %v1862_v7  ;;  %v586_v28 = vmul.f32 %v585_v55, %v1864_v8  ;;  %v608_v1 = vmul.f32 %v607_v60, %v1855_v4 }
  0x79   : > { %1576 = vmatpush3.msra.mxu1 %v565_v19  ;;  %vm597_vm4 = vcmp.ge.f32.partialorder %v595_v21, 0.0  ;;  %v599_v29 = vmul.f32 0.01, %v595_v21  ;;  %v592_v32 = vmul.f32 %v591_v20, %v1874_v15  ;;  %v615_v5 = vmul.f32 %v614_v3, %v1862_v7 }
  0x7a   : > { %v624_v30 = vadd.f32 %v622_v22, %v618_v23  ;;  %v582_v31 = vadd.f32 %v580_v27, %v576_v24  ;;  %v611_v10 = vadd.f32 %v610_v61, %v608_v1  ;;  %v621_v34 = vmul.f32 %v620_v17, %v1864_v8 }
  0x7b   : > { %v2136_v33 = vsel %vm597_vm4, %v595_v21, %v599_v29  ;;  %v627_v37 = vmul.f32 %v626_v18, %v1874_v15  ;;  %vm964_vm6 = vcmask 130048  }
  0x7c   : > { %1580 = vmatprep.subr.mxu0 %v2136_v33  ;;  %v630_v35 = vadd.f32 %v628_v0, %v624_v30  ;;  %v588_v43 = vadd.f32 %v586_v28, %v582_v31  ;;  %v617_v36 = vadd.f32 %v615_v5, %v611_v10 }
  0x7e   : > { %vm632_vm5 = vcmp.ge.f32.partialorder %v630_v35, 0.0  ;;  %v634_v4 = vmul.f32 0.01, %v630_v35  ;;  %v2141_v47 = vadd.f32 %v592_v32, %v588_v43  ;;  %v623_v38 = vadd.f32 %v621_v34, %v617_v36 }
  0x80   : > { %v2143_v39 = vsel %vm632_vm5, %v630_v35, %v634_v4  ;;  %v2146_v7 = vadd.f32 %v627_v37, %v623_v38  ;;  %v598_v29 = vmul.f32 0.01, %v2141_v47  ;;  %vm596_vm7 = vcmp.ge.f32.partialorder %v2141_v47, 0.0 }
  0x81   : > { %1587 = vmatprep.subr.mxu1 %v2143_v39 }
  0x82   : > { %v633_v30 = vmul.f32 0.01, %v2146_v7  ;;  %vm631_vm8 = vcmp.ge.f32.partialorder %v2146_v7, 0.0  ;;  %v600_v5 = vsel %vm596_vm7, %v2141_v47, %v598_v29 }
  0x84   : > { %v635_v10 = vsel %vm631_vm8, %v2146_v7, %v633_v30 }
 0x10e   : > { %v1544_v40 = vpop.f32.mrf.mxu0 }
 0x10f   : > { %v1551_v8 = vpop.f32.mrf.mxu1  ;;  %v972_v42 = vsel %vm964_vm6, %v1544_v40, 0.0 }
 0x110   : > { %v730_v50 = vpop.f32.mrf.mxu0  ;;  %v973_v15 = vsel %vm964_vm6, %v1551_v8, 0.0 }
 0x111   : > { %v805_v41 = vpop.f32.mrf.mxu1  ;;  %v965_v44 = vsel %vm964_vm6, %v730_v50, 0.0  ;;  %v974_v46 = vadd.f32 %v973_v15, %v972_v42 }
 0x112   : > { %v966_v45 = vsel %vm964_vm6, %v805_v41, 0.0 }
 0x113   : > { %v967_v49 = vadd.f32 %v966_v45, %v965_v44 }
 0x128   : > { %v1558_v58 = vpop.f32.mrf.mxu0 }
 0x129   : > { %v975_v48 = vsel %vm964_vm6, %v1558_v58, 0.0 }
 0x12a   : > { %v976_v51 = vadd.f32 %v975_v48, %v974_v46  ;;  %v880_v53 = vpop.f32.mrf.mxu0 }
 0x12b   : > { %v968_v54 = vsel %vm964_vm6, %v880_v53, 0.0 }
 0x12c   : > { %v1565_v55 = vpop.f32.mrf.mxu1  ;;  %v969_v56 = vadd.f32 %v968_v54, %v967_v49 }
 0x12d   : > { %v977_v52 = vsel %vm964_vm6, %v1565_v55, 0.0 }
 0x12e   : > { %v978_v57 = vadd.f32 %v977_v52, %v976_v51  ;;  %v955_v16 = vpop.f32.mrf.mxu1 }
 0x12f   : > { %v970_v59 = vsel %vm964_vm6, %v955_v16, 0.0 }
 0x130   : > { %v971_v20 = vadd.f32 %v970_v59, %v969_v56  ;;  %v980_v60 = vsel %vm964_vm6, %v978_v57, -inf }
 0x132   : > { %v979_v61 = vsel %vm964_vm6, %v971_v20, -inf }
 0x133   : > { %v981_v25 = vmax.f32 %v979_v61, %v980_v60 }
 0x135   : > { %v982_v26 = vrot.slane %v981_v25, 4 }
 0x137   : > { %v983_v62 = vmax.f32 %v981_v25, %v982_v26 }
 0x139   : > { %v984_v63 = vrot.slane %v983_v62, 2 }
 0x13b   : > { %v985_v2 = vmax.f32 %v983_v62, %v984_v63 }
 0x13d   : > { %v986_v3 = vrot.slane %v985_v2, 1 }
 0x13f   : > { %v987_v6 = vmax.f32 %v985_v2, %v986_v3 }
 0x141   : > { %v988_v9 = vsub.f32 %v971_v20, %v987_v6  ;;  %v989_v11 = vsub.f32 %v978_v57, %v987_v6 }
 0x143   : > { %v990_v12 = vmul.f32 1.442695, %v988_v9  ;;  %v992_v13 = vmul.f32 1.442695, %v989_v11 }
 0x145   : > { %1648 = vpow2.f32 %v990_v12 }
 0x146   : > { %1650 = vpow2.f32 %v992_v13 }
 0x152   : > { %v1649_v14 = vpop.eup %1648 }
 0x153   : > { %v1651_v17 = vpop.eup %1650  ;;  %v994_v18 = vsel %vm964_vm6, %v1649_v14, 0.0 }
 0x154   : > { %v995_v19 = vsel %vm964_vm6, %v1651_v17, 0.0 }
 0x155   : > { %v996_v21 = vadd.f32 %v995_v19, %v994_v18 }
 0x157   : > { %v997_v22 = vrot.slane %v996_v21, 4 }
 0x159   : > { %v998_v0 = vadd.f32 %v997_v22, %v996_v21 }
 0x15b   : > { %v999_v23 = vrot.slane %v998_v0, 2 }
 0x15d   : > { %v1000_v24 = vadd.f32 %v999_v23, %v998_v0 }
 0x15f   : > { %v1001_v27 = vrot.slane %v1000_v24, 1 }
 0x161   : > { %v1002_v28 = vadd.f32 %v1001_v27, %v1000_v24 }
 0x163   : > { %1652 = vrcp.f32 %v1002_v28 }
 0x170   : > { %v1653_v1 = vpop.eup %1652 }
 0x171   : > { %v1004_v31 = vmul.f32 %v1653_v1, %v1649_v14  ;;  %v1005_v32 = vmul.f32 %v1653_v1, %v1651_v17 }
 0x173   : > { %1570 = vmatprep.mubr.msk.f32.mxu0 %vm964_vm6, %v1004_v31  ;;  %1577 = vmatprep.mubr.msk.f32.mxu1 %vm964_vm6, %v1004_v31 }
 0x174   : > { %1571 = vmatmul.mubr.msk.f32.vlgmr.msra.gmra.mxu0 %vm964_vm6, %v1005_v32  ;;  %1578 = vmatmul.mubr.msk.f32.vlgmr.msra.gmra.mxu1 %vm964_vm6, %v1005_v32 }
 0x175   : > { %1581 = vmatpush3.msra.mxu0 %v2136_v33  ;;  %1588 = vmatpush3.msra.mxu1 %v2143_v39 }
 0x176   : > { %1582 = vmatprep.subr.mxu0 %v600_v5  ;;  %1584 = vmatprep.mubr.msk.f32.mxu0 %vm964_vm6, %v1004_v31 }
 0x177   : > { %1589 = vmatprep.subr.mxu1 %v635_v10  ;;  %1591 = vmatprep.mubr.msk.f32.mxu1 %vm964_vm6, %v1004_v31 }
 0x178   : > { %1583 = vmatpush3.msra.mxu0 %v600_v5  ;;  %1590 = vmatpush3.msra.mxu1 %v635_v10 }
 0x179   : > { %1585 = vmatmul.mubr.msk.f32.vlgmr.msra.gmra.mxu0 %vm964_vm6, %v1005_v32  ;;  %1592 = vmatmul.mubr.msk.f32.vlgmr.msra.gmra.mxu1 %vm964_vm6, %v1005_v32 }
 0x234   : > { %v1572_v34 = vpop.f32.mrf.mxu0  ;;  %v1579_v35 = vpop.f32.mrf.mxu1 }
 0x235   : > { %1313 = vst [vmem:[%s194_s4 + $0x8] sm:$0xff] %v1572_v34  ;;  %1315 = vst [vmem:[%s194_s4 + $0x18] sm:$0xff] %v1579_v35 }
 0x236   : > { %v1078_v33 = vpop.f32.mrf.mxu0  ;;  %v1153_v43 = vpop.f32.mrf.mxu1 }
 0x237   : > { %1312 = vst [vmem:[%s194_s4] sm:$0xff] %v1078_v33  ;;  %1314 = vst [vmem:[%s194_s4 + $0x10] sm:$0xff] %v1153_v43 }
 0x239   : > { %v1586_v36 = vpop.f32.mrf.mxu0  ;;  %v1593_v37 = vpop.f32.mrf.mxu1 }
 0x23a   : > { %1317 = vst [vmem:[%s194_s4 + $0x28] sm:$0xff] %v1586_v36  ;;  %1319 = vst [vmem:[%s194_s4 + $0x38] sm:$0xff] %v1593_v37 }
 0x23b   : > { %v1228_v4 = vpop.f32.mrf.mxu0  ;;  %v1303_v47 = vpop.f32.mrf.mxu1 }
 0x23c   : > { %1316 = vst [vmem:[%s194_s4 + $0x20] sm:$0xff] %v1228_v4  ;;  %1318 = vst [vmem:[%s194_s4 + $0x30] sm:$0xff] %v1303_v47 }
 0x23d   : > { %1682 = shalt.err (!%p1679_p2)
}
 0x23e   : > { %s1683_s20 = scalar_lea.hbm %s2183_s11, 1024  ;;  %s1687_s26 = scalar_lea.hbm %s2228_s3, 2048 }
 0x23f   : > { %p1684_p3 = scmp.ne.s32.totalorder %s2183_s11, %s1683_s20  ;;  %p1688_p8 = scmp.lt.s32.totalorder %s2183_s11, %s2228_s3 }
 0x240   : > { %p1689_p11 = scmp.lt.s32.totalorder %s1687_s26, %s1683_s20 }
 0x241   : > { %p1685_p4 = pnand %p1684_p3, %p1799_p5 }
 0x242   : > { %p1690_p9 = por %p1689_p11, %p1688_p8 }
 0x243   : > { %p1686_p7 = pneg %p1685_p4 }
 0x245   : > { %p1691_p10 = pnand %p1690_p9, %p1686_p7 }
 0x247   : > { %1694 = shalt.err (!%p1691_p10)
}
 0x248   : > { %s1739_s29 = smov 128   ;;  %s1740_s30 = smov 8  }
 0x249   : > { %1598 = dma.vmem_to_hbm [thread:$0]  (%p1799_p5), %s2178_s5, 1024, %s2183_s11, %s2185_s17, %s1739_s29, %s1739_s29, %s1740_s30  }
 0x24a PF: > { %p1610_p12 = scmp.ge.s32.totalorder %s1733_s15, 2  ;;  %s1349_s4 = sand.u32 1, %s1721_s12  }
 0x24b   : > { %s1350_s6 = scalar_lea.sflag [#allocation4], %s1349_s4 }
 0x24c   : > { %p1605_p13 = pnand %p1610_p12, %p1803_p6 }
 0x24e   : > { %p1606_p0 = pneg %p1605_p13 }
 0x250   : > { %1716 = dma.done.wait (%p1606_p0), %s1350_s6, 1024  }
 0x251   : > { %1718 = vsyncadd (%p1606_p0), %s1350_s6, 4294966272  ;;  %p14_p1 = scmp.ge.s32.totalorder %s1786_s18, 4   ;;  %s2233_s12 = smov %s1725_s13 }
 0x252   : > { %s2234_s13 = smov %s1729_s14  ;;  %s2235_s14 = smov %s1797_s21 }
 0x253   : > { %s2236_s15 = smov %s1786_s18  ;;  %16 = sbr.rel (!%p14_p1) target bundleno = 4 (0x4), region = 86 }
 0x258   :  { %1355 = vsyncpa [#allocation4], 1 }
 0x259   :  { %1357 = vsyncpa [#allocation4 + $0x1], 1 }
 0x25a   :  { %1358 = vsyncpa [#allocation5], 1 }
 0x25b   :  { %1360 = vsyncpa [#allocation5 + $0x1], 1 }

</bundles_post_ra>
